<compile_context>
chip_gen: v7x
topology: tpu7x:2x2x1
jax: 0.10.0
libtpu: 0.0.40
codegen_flags: <defaults>
</compile_context>

<pallas_src>
import functools

import jax
import jax.numpy as jnp
from jax.experimental import pallas as pl
from jax.experimental.pallas import tpu as pltpu


def point_transformer_kernel(
    x_ref, pos_ref,
    w_in_ref,      # (D, 2*Ha + D) = [Wq@Wa1 | Wk@Wa1 | Wv]        bf16
    wp1_ref,       # (P, Hp)                                        bf16
    wp2cat_ref,    # (Hp, Ha + D) = [Wp2@Wa1 | Wp2]                 bf16
    wa2_ref,       # (Ha, D)                                        bf16
    bp1_ref,       # (1, Hp)                                        f32
    qw_bias_ref,   # (1, Ha) = ba1 + bp2@Wa1                        f32
    v_bias_ref,    # (1, D)  = bp2                                  f32
    out_ref,       # (1, bblk*n, D)
    *, bblk, n,
):
    f32 = jnp.float32
    bf16 = jnp.bfloat16
    BN = bblk * n
    Ha = wa2_ref.shape[0]
    D = wa2_ref.shape[1]
    Hp = wp1_ref.shape[1]

    x = x_ref[0].astype(bf16)        # (BN, D)
    pos = pos_ref[0].astype(bf16)    # (BN, P)

    # ---- one fused input projection: x @ [Wq@Wa1 | Wk@Wa1 | Wv] ----
    proj = jnp.dot(x, w_in_ref[...], preferred_element_type=f32)     # (BN, 2Ha+D)
    qw = proj[:, :Ha] + qw_bias_ref[...]      # ba1 + bp2@Wa1 folded in (per-row)
    kw = proj[:, Ha:2 * Ha]
    v = proj[:, 2 * Ha:] + v_bias_ref[...]    # bp2 folded in (per-row)

    # ---- pos_mlp layer 1, factored out of the N^2 domain ----
    # relu((pos_i - pos_j) @ Wp1 + bp1) == relu((a + bp1)_i - a_j)
    a = jnp.dot(pos, wp1_ref[...], preferred_element_type=f32)       # (BN, Hp)
    a_i = (a + bp1_ref[...]).reshape(bblk, n, Hp)
    a_j = a.reshape(bblk, n, Hp)
    h = jnp.maximum(a_i[:, :, None, :] - a_j[:, None, :, :], 0.0)    # (bblk,n,n,Hp)

    # ---- pos_mlp layer 2 + attn_mlp layer-1 rel-path, one fused matmul ----
    # h @ [Wp2@Wa1 | Wp2] = [relw | rel_emb]   (bp2 already hoisted out)
    hcat = jnp.dot(h.reshape(BN * n, Hp).astype(bf16), wp2cat_ref[...],
                   preferred_element_type=f32)                       # (BN*n, Ha+D)
    relw = hcat[:, :Ha].reshape(bblk, n, n, Ha)
    rel_emb = hcat[:, Ha:].reshape(bblk, n, n, D)

    # ---- attn_mlp layer 1, factored:
    #   (q_i - k_j + rel_emb) @ Wa1 + ba1 == qw_i - kw_j + relw_ij  (biases in qw)
    qw3 = qw.reshape(bblk, n, Ha)
    kw3 = kw.reshape(bblk, n, Ha)
    h2 = jnp.maximum(qw3[:, :, None, :] - kw3[:, None, :, :] + relw, 0.0)

    # ---- attn_mlp layer 2; ba2 dropped (constant over j -> cancels in softmax) ----
    sim = jnp.dot(h2.reshape(BN * n, Ha).astype(bf16), wa2_ref[...],
                  preferred_element_type=f32).reshape(bblk, n, n, D)

    vv = v.reshape(bblk, 1, n, D) + rel_emb            # v_j (+bp2) + rel_emb_ij

    # ---- softmax over j (torch dim=-2) and weighted sum over j, in f32 ----
    m = jnp.max(sim, axis=2, keepdims=True)
    e = jnp.exp(sim - m)
    denom = jnp.sum(e, axis=2)                         # (bblk, n, D)
    num = jnp.sum(e * vv, axis=2)                      # (bblk, n, D)
    agg = num * pl.reciprocal(denom, approx=True)

    # (bblk, n, D) -> (bblk*n, D) is layout-trivial (n == sublane tile); no
    # sublane->lane merge, output stays (G, block_bt*N, D).
    out_ref[0] = agg.reshape(BN, D).astype(out_ref.dtype)


def _fuse_params(params):
    """Pre-fuse weights/biases in f32, then cast MXU operands to bf16."""
    D = params["wqkv"].shape[0]
    wq = params["wqkv"][:, :D]
    wk = params["wqkv"][:, D:2 * D]
    wv = params["wqkv"][:, 2 * D:]
    wa1 = params["wa1"]
    w_in = jnp.concatenate([wq @ wa1, wk @ wa1, wv], axis=1)            # (D, 2Ha+D)
    wp2cat = jnp.concatenate([params["wp2"] @ wa1, params["wp2"]], axis=1)  # (Hp, Ha+D)
    qw_bias = params["ba1"] + params["bp2"] @ wa1                       # (1, Ha)
    return {
        "w_in": w_in.astype(jnp.bfloat16),
        "wp1": params["wp1"].astype(jnp.bfloat16),
        "wp2cat": wp2cat.astype(jnp.bfloat16),
        "wa2": params["wa2"].astype(jnp.bfloat16),
        "bp1": params["bp1"].astype(jnp.float32),
        "qw_bias": qw_bias.astype(jnp.float32),
        "v_bias": params["bp2"].astype(jnp.float32),
        # ba2 is intentionally dropped: it is constant over the softmax axis.
    }


def _choose_block_bt(BT, N, Hp, Ha, D, budget_bytes):
    """Largest divisor of BT whose live N^2-domain intermediates fit the budget."""
    pad = lambda c: ((c + 127) // 128) * 128          # lane padding to 128
    n2 = N * N
    per = 0
    per += n2 * pad(Hp) * 4                           # h (f32)
    per += n2 * pad(Ha + D) * 4                       # hcat = relw | rel_emb (f32)
    per += n2 * pad(Ha) * 4                           # h2 (f32)
    per += 3 * n2 * pad(D) * 4                        # sim, e, vv (f32)
    per = int(per * 1.5)                              # headroom for temps / bf16 copies
    bt = max(1, min(BT, budget_bytes // max(per, 1)))
    while BT % bt:
        bt -= 1
    return bt


def point_transformer_layer(x, pos, params, mask=None, *,
                            block_bt=None, num_cores=1,
                            vmem_limit_bytes=48 * 1024 * 1024):
    """x: (B*T, N, D) float32, pos: (B, T, J, C, N) float32."""
    # TODO(synk): optional `mask` (masked_fill_) path not implemented.
    if mask is not None:
        raise NotImplementedError("mask path not implemented; only mask=None")

    B, T, J, C, N = pos.shape
    BT, n_pts, D = x.shape
    assert BT == B * T and n_pts == N
    # torch: pos[:, :, :, :2, :].permute(0,1,4,2,3).view(B*T, N, -1)
    pos_flat = jnp.transpose(pos[:, :, :, :2, :], (0, 1, 4, 2, 3)).reshape(BT, N, J * 2)
    P = J * 2
    Hp = params["wp1"].shape[1]
    Ha = params["wa1"].shape[1]

    if block_bt is None:
        # Budget ~half the scoped VMEM limit for in-kernel intermediates
        # (48 MiB scoped / 24 MiB intermediates is conservative even for
        # v7x's 64 MiB physical VMEM; inputs/outputs here are tiny).
        block_bt = _choose_block_bt(BT, N, Hp, Ha, D, vmem_limit_bytes // 2)
        # v7x: keep the "parallel" grid axis a multiple of the TensorCore count
        # so both cores get work; on v5e/v6e (num_cores=1) this is a no-op and
        # we prefer the smallest grid (ideally G=1).
        if num_cores > 1:
            while block_bt > 1 and (BT // block_bt) % num_cores != 0:
                block_bt -= 1
                while BT % block_bt:
                    block_bt -= 1
    assert BT % block_bt == 0, "block_bt must divide B*T"
    G = BT // block_bt

    fused = _fuse_params(params)
    x_r = x.reshape(G, block_bt * N, D)
    pos_r = pos_flat.reshape(G, block_bt * N, P)

    kernel = functools.partial(point_transformer_kernel, bblk=block_bt, n=N)

    grid_spec = pltpu.PrefetchScalarGridSpec(
        num_scalar_prefetch=0,
        grid=(G,),
        in_specs=[
            pl.BlockSpec((1, block_bt * N, D), lambda g: (g, 0, 0)),    # x
            pl.BlockSpec((1, block_bt * N, P), lambda g: (g, 0, 0)),    # pos
            pl.BlockSpec((D, 2 * Ha + D), lambda g: (0, 0)),            # [WqA|WkA|Wv]
            pl.BlockSpec((P, Hp), lambda g: (0, 0)),                    # Wp1
            pl.BlockSpec((Hp, Ha + D), lambda g: (0, 0)),               # [Wp2A|Wp2]
            pl.BlockSpec((Ha, D), lambda g: (0, 0)),                    # Wa2
            pl.BlockSpec((1, Hp), lambda g: (0, 0)),                    # bp1
            pl.BlockSpec((1, Ha), lambda g: (0, 0)),                    # ba1 + bp2@Wa1
            pl.BlockSpec((1, D), lambda g: (0, 0)),                     # bp2
        ],
        out_specs=pl.BlockSpec((1, block_bt * N, D), lambda g: (g, 0, 0)),
    )

    out = pl.pallas_call(
        kernel,
        out_shape=jax.ShapeDtypeStruct((G, block_bt * N, D), x.dtype),
        grid_spec=grid_spec,
        compiler_params=pltpu.CompilerParams(
            dimension_semantics=("parallel",),
            vmem_limit_bytes=vmem_limit_bytes,
        ),
    )(x_r, pos_r,
      fused["w_in"], fused["wp1"], fused["wp2cat"], fused["wa2"],
      fused["bp1"], fused["qw_bias"], fused["v_bias"])

    return out.reshape(BT, N, D)


def reference(x, pos, params):
    """Pure-JAX f32 reference mirroring the PyTorch forward (unfactored)."""
    B, T, J, C, N = pos.shape
    D = x.shape[-1]
    pos_flat = jnp.transpose(pos[:, :, :, :2, :], (0, 1, 4, 2, 3)).reshape(B * T, N, J * 2)
    qkv = x @ params["wqkv"]
    q, k, v = qkv[..., :D], qkv[..., D:2 * D], qkv[..., 2 * D:]
    rel = pos_flat[:, :, None, :] - pos_flat[:, None, :, :]
    h = jnp.maximum(rel @ params["wp1"] + params["bp1"][0], 0.0)
    rel_emb = h @ params["wp2"] + params["bp2"][0]
    qk_rel = q[:, :, None, :] - k[:, None, :, :]
    vv = v[:, None, :, :] + rel_emb
    h2 = jnp.maximum((qk_rel + rel_emb) @ params["wa1"] + params["ba1"][0], 0.0)
    sim = h2 @ params["wa2"] + params["ba2"][0]
    attn = jax.nn.softmax(sim, axis=-2)
    return jnp.einsum("bijd,bijd->bid", attn, vv)


def init_params(key, dim, pos_dim=34, pos_hidden=64, attn_mult=4):
    ks = jax.random.split(key, 9)
    s = 0.05
    return {
        "wqkv": s * jax.random.normal(ks[0], (dim, 3 * dim), jnp.float32),
        "wp1":  s * jax.random.normal(ks[1], (pos_dim, pos_hidden), jnp.float32),
        "bp1":  s * jax.random.normal(ks[2], (1, pos_hidden), jnp.float32),
        "wp2":  s * jax.random.normal(ks[3], (pos_hidden, dim), jnp.float32),
        "bp2":  s * jax.random.normal(ks[4], (1, dim), jnp.float32),
        "wa1":  s * jax.random.normal(ks[5], (dim, dim * attn_mult), jnp.float32),
        "ba1":  s * jax.random.normal(ks[6], (1, dim * attn_mult), jnp.float32),
        "wa2":  s * jax.random.normal(ks[7], (dim * attn_mult, dim), jnp.float32),
        "ba2":  s * jax.random.normal(ks[8], (1, dim), jnp.float32),
    }


if __name__ == "__main__":
    B, T, J, C, N, dim = 2, 2, 17, 3, 8, 32

    key = jax.random.PRNGKey(0)
    kx, kp, kw = jax.random.split(key, 3)
    x = jax.random.normal(kx, (B * T, N, dim), jnp.float32)
    pos = jax.random.normal(kp, (B, T, J, C, N), jnp.float32)
    params = init_params(kw, dim)

    out = point_transformer_layer(x, pos, params)
    out = jax.block_until_ready(out)

    ref = reference(x, pos, params)
    # Tolerance widened to 1e-2 for the bf16-MXU / approx-reciprocal path
    # (review item 6 / correctness note 1); still far below any algorithmic bug.
    if not jnp.allclose(out, ref, rtol=1e-2, atol=1e-2):
        err = float(jnp.max(jnp.abs(out - ref)))
        raise AssertionError(f"Pallas kernel output does not match reference (max abs err={err})")

    print("KERNEL_OK")
</pallas_src>

<mosaic_0001>
module attributes {stable_mosaic.version = 11 : i64} {
  func.func @point_transformer_kernel(%arg0: i32, %arg1: memref<1x32x32xf32, #tpu.memory_space<vmem>>, %arg2: memref<1x32x34xf32, #tpu.memory_space<vmem>>, %arg3: memref<32x288xbf16, #tpu.memory_space<vmem>>, %arg4: memref<34x64xbf16, #tpu.memory_space<vmem>>, %arg5: memref<64x160xbf16, #tpu.memory_space<vmem>>, %arg6: memref<128x32xbf16, #tpu.memory_space<vmem>>, %arg7: memref<1x64xf32, #tpu.memory_space<vmem>>, %arg8: memref<1x128xf32, #tpu.memory_space<vmem>>, %arg9: memref<1x32xf32, #tpu.memory_space<vmem>>, %arg10: memref<1x32x32xf32, #tpu.memory_space<vmem>>) attributes {dimension_semantics = [#tpu.dimension_semantics<parallel>], iteration_bounds = array<i64: 1>, scalar_prefetch = 0 : i64, scratch_operands = 0 : i64, tpu.core_type = #tpu.core_type<tc>, window_params = [{transform_indices = @transform_0, window_bounds = array<i64: 1, 32, 32>}, {transform_indices = @transform_1, window_bounds = array<i64: 1, 32, 34>}, {pipeline_mode = #tpu.pipeline_mode<synchronous>, transform_indices = @transform_2, window_bounds = array<i64: 32, 288>}, {pipeline_mode = #tpu.pipeline_mode<synchronous>, transform_indices = @transform_3, window_bounds = array<i64: 34, 64>}, {pipeline_mode = #tpu.pipeline_mode<synchronous>, transform_indices = @transform_4, window_bounds = array<i64: 64, 160>}, {pipeline_mode = #tpu.pipeline_mode<synchronous>, transform_indices = @transform_5, window_bounds = array<i64: 128, 32>}, {pipeline_mode = #tpu.pipeline_mode<synchronous>, transform_indices = @transform_6, window_bounds = array<i64: 1, 64>}, {pipeline_mode = #tpu.pipeline_mode<synchronous>, transform_indices = @transform_7, window_bounds = array<i64: 1, 128>}, {pipeline_mode = #tpu.pipeline_mode<synchronous>, transform_indices = @transform_8, window_bounds = array<i64: 1, 32>}, {transform_indices = @transform_9, window_bounds = array<i64: 1, 32, 32>}]} {
    %c0 = arith.constant 0 : index
    %c0_0 = arith.constant 0 : index
    %c0_1 = arith.constant 0 : index
    %0 = vector.load %arg1[%c0, %c0_0, %c0_1] : memref<1x32x32xf32, #tpu.memory_space<vmem>>, vector<1x32x32xf32>
    %1 = vector.shape_cast %0 : vector<1x32x32xf32> to vector<32x32xf32>
    %2 = arith.truncf %1 : vector<32x32xf32> to vector<32x32xbf16>
    %c0_2 = arith.constant 0 : index
    %c0_3 = arith.constant 0 : index
    %c0_4 = arith.constant 0 : index
    %3 = vector.load %arg2[%c0_2, %c0_3, %c0_4] : memref<1x32x34xf32, #tpu.memory_space<vmem>>, vector<1x32x34xf32>
    %4 = vector.shape_cast %3 : vector<1x32x34xf32> to vector<32x34xf32>
    %5 = arith.truncf %4 : vector<32x34xf32> to vector<32x34xbf16>
    %c0_5 = arith.constant 0 : index
    %c0_6 = arith.constant 0 : index
    %6 = vector.load %arg3[%c0_5, %c0_6] : memref<32x288xbf16, #tpu.memory_space<vmem>>, vector<32x288xbf16>
    %cst = arith.constant dense<0.000000e+00> : vector<32x288xf32>
    %7 = tpu.matmul %2, %6, %cst {dimension_numbers = #tpu.dot_dimension_numbers<[1], [0], [0], [1], [0, 0, 1, 1], [], []>} : vector<32x32xbf16>, vector<32x288xbf16>, vector<32x288xf32> -> vector<32x288xf32>
    %8 = vector.extract_strided_slice %7 {offsets = [0, 0], sizes = [32, 128], strides = [1, 1]} : vector<32x288xf32> to vector<32x128xf32>
    %c0_7 = arith.constant 0 : index
    %c0_8 = arith.constant 0 : index
    %9 = vector.load %arg8[%c0_7, %c0_8] : memref<1x128xf32, #tpu.memory_space<vmem>>, vector<1x128xf32>
    %10 = vector.broadcast %9 : vector<1x128xf32> to vector<32x128xf32>
    %11 = arith.addf %8, %10 : vector<32x128xf32>
    %12 = vector.extract_strided_slice %7 {offsets = [0, 128], sizes = [32, 128], strides = [1, 1]} : vector<32x288xf32> to vector<32x128xf32>
    %13 = vector.extract_strided_slice %7 {offsets = [0, 256], sizes = [32, 32], strides = [1, 1]} : vector<32x288xf32> to vector<32x32xf32>
    %c0_9 = arith.constant 0 : index
    %c0_10 = arith.constant 0 : index
    %14 = vector.load %arg9[%c0_9, %c0_10] : memref<1x32xf32, #tpu.memory_space<vmem>>, vector<1x32xf32>
    %15 = vector.broadcast %14 : vector<1x32xf32> to vector<32x32xf32>
    %16 = arith.addf %13, %15 : vector<32x32xf32>
    %c0_11 = arith.constant 0 : index
    %c0_12 = arith.constant 0 : index
    %17 = vector.load %arg4[%c0_11, %c0_12] : memref<34x64xbf16, #tpu.memory_space<vmem>>, vector<34x64xbf16>
    %cst_13 = arith.constant dense<0.000000e+00> : vector<32x64xf32>
    %18 = tpu.matmul %5, %17, %cst_13 {dimension_numbers = #tpu.dot_dimension_numbers<[1], [0], [0], [1], [0, 0, 1, 1], [], []>} : vector<32x34xbf16>, vector<34x64xbf16>, vector<32x64xf32> -> vector<32x64xf32>
    %c0_14 = arith.constant 0 : index
    %c0_15 = arith.constant 0 : index
    %19 = vector.load %arg7[%c0_14, %c0_15] : memref<1x64xf32, #tpu.memory_space<vmem>>, vector<1x64xf32>
    %20 = vector.broadcast %19 : vector<1x64xf32> to vector<32x64xf32>
    %21 = arith.addf %18, %20 : vector<32x64xf32>
    %22 = vector.shape_cast %21 : vector<32x64xf32> to vector<4x8x64xf32>
    %23 = vector.shape_cast %18 : vector<32x64xf32> to vector<4x8x64xf32>
    %24 = vector.shape_cast %22 : vector<4x8x64xf32> to vector<4x8x1x64xf32>
    %25 = vector.shape_cast %23 : vector<4x8x64xf32> to vector<4x1x8x64xf32>
    %26 = vector.broadcast %24 : vector<4x8x1x64xf32> to vector<4x8x8x64xf32>
    %27 = vector.broadcast %25 : vector<4x1x8x64xf32> to vector<4x8x8x64xf32>
    %28 = arith.subf %26, %27 : vector<4x8x8x64xf32>
    %cst_16 = arith.constant 0.000000e+00 : f32
    %29 = vector.broadcast %cst_16 : f32 to vector<4x8x8x64xf32>
    %30 = arith.maximumf %28, %29 : vector<4x8x8x64xf32>
    %31 = vector.shape_cast %30 : vector<4x8x8x64xf32> to vector<256x64xf32>
    %32 = arith.truncf %31 : vector<256x64xf32> to vector<256x64xbf16>
    %c0_17 = arith.constant 0 : index
    %c0_18 = arith.constant 0 : index
    %33 = vector.load %arg5[%c0_17, %c0_18] : memref<64x160xbf16, #tpu.memory_space<vmem>>, vector<64x160xbf16>
    %cst_19 = arith.constant dense<0.000000e+00> : vector<256x160xf32>
    %34 = tpu.matmul %32, %33, %cst_19 {dimension_numbers = #tpu.dot_dimension_numbers<[1], [0], [0], [1], [0, 0, 1, 1], [], []>} : vector<256x64xbf16>, vector<64x160xbf16>, vector<256x160xf32> -> vector<256x160xf32>
    %35 = vector.extract_strided_slice %34 {offsets = [0, 0], sizes = [256, 128], strides = [1, 1]} : vector<256x160xf32> to vector<256x128xf32>
    %36 = vector.shape_cast %35 : vector<256x128xf32> to vector<4x8x8x128xf32>
    %37 = vector.extract_strided_slice %34 {offsets = [0, 128], sizes = [256, 32], strides = [1, 1]} : vector<256x160xf32> to vector<256x32xf32>
    %38 = vector.shape_cast %37 : vector<256x32xf32> to vector<4x8x8x32xf32>
    %39 = vector.shape_cast %11 : vector<32x128xf32> to vector<4x8x128xf32>
    %40 = vector.shape_cast %12 : vector<32x128xf32> to vector<4x8x128xf32>
    %41 = vector.shape_cast %39 : vector<4x8x128xf32> to vector<4x8x1x128xf32>
    %42 = vector.shape_cast %40 : vector<4x8x128xf32> to vector<4x1x8x128xf32>
    %43 = vector.broadcast %41 : vector<4x8x1x128xf32> to vector<4x8x8x128xf32>
    %44 = vector.broadcast %42 : vector<4x1x8x128xf32> to vector<4x8x8x128xf32>
    %45 = arith.subf %43, %44 : vector<4x8x8x128xf32>
    %46 = arith.addf %45, %36 : vector<4x8x8x128xf32>
    %cst_20 = arith.constant 0.000000e+00 : f32
    %47 = vector.broadcast %cst_20 : f32 to vector<4x8x8x128xf32>
    %48 = arith.maximumf %46, %47 : vector<4x8x8x128xf32>
    %49 = vector.shape_cast %48 : vector<4x8x8x128xf32> to vector<256x128xf32>
    %50 = arith.truncf %49 : vector<256x128xf32> to vector<256x128xbf16>
    %c0_21 = arith.constant 0 : index
    %c0_22 = arith.constant 0 : index
    %51 = vector.load %arg6[%c0_21, %c0_22] : memref<128x32xbf16, #tpu.memory_space<vmem>>, vector<128x32xbf16>
    %cst_23 = arith.constant dense<0.000000e+00> : vector<256x32xf32>
    %52 = tpu.matmul %50, %51, %cst_23 {dimension_numbers = #tpu.dot_dimension_numbers<[1], [0], [0], [1], [0, 0, 1, 1], [], []>} : vector<256x128xbf16>, vector<128x32xbf16>, vector<256x32xf32> -> vector<256x32xf32>
    %53 = vector.shape_cast %52 : vector<256x32xf32> to vector<4x8x8x32xf32>
    %54 = vector.shape_cast %16 : vector<32x32xf32> to vector<4x1x8x32xf32>
    %55 = vector.broadcast %54 : vector<4x1x8x32xf32> to vector<4x8x8x32xf32>
    %56 = arith.addf %55, %38 : vector<4x8x8x32xf32>
    %cst_24 = arith.constant dense<0xFF800000> : vector<4x8x32xf32>
    %57 = vector.multi_reduction <maximumf>, %53, %cst_24 [2] : vector<4x8x8x32xf32> to vector<4x8x32xf32>
    %58 = vector.shape_cast %57 : vector<4x8x32xf32> to vector<4x8x1x32xf32>
    %59 = vector.broadcast %58 : vector<4x8x1x32xf32> to vector<4x8x8x32xf32>
    %60 = arith.subf %53, %59 : vector<4x8x8x32xf32>
    %61 = math.exp %60 : vector<4x8x8x32xf32>
    %cst_25 = arith.constant dense<0.000000e+00> : vector<4x8x32xf32>
    %62 = vector.multi_reduction <add>, %61, %cst_25 [2] : vector<4x8x8x32xf32> to vector<4x8x32xf32>
    %63 = arith.mulf %61, %56 : vector<4x8x8x32xf32>
    %cst_26 = arith.constant dense<0.000000e+00> : vector<4x8x32xf32>
    %64 = vector.multi_reduction <add>, %63, %cst_26 [2] : vector<4x8x8x32xf32> to vector<4x8x32xf32>
    %65 = tpu.reciprocal %62 {approx = true} : vector<4x8x32xf32> -> vector<4x8x32xf32>
    %66 = arith.mulf %64, %65 : vector<4x8x32xf32>
    %67 = vector.shape_cast %66 : vector<4x8x32xf32> to vector<32x32xf32>
    %c0_27 = arith.constant 0 : index
    %c0_28 = arith.constant 0 : index
    %c0_29 = arith.constant 0 : index
    %68 = vector.load %arg10[%c0_27, %c0_28, %c0_29] : memref<1x32x32xf32, #tpu.memory_space<vmem>>, vector<1x32x32xf32>
    %69 = vector.shape_cast %68 : vector<1x32x32xf32> to vector<32x32xf32>
    %70 = vector.shape_cast %67 : vector<32x32xf32> to vector<1x32x32xf32>
    tpu.vector_store %arg10[%c0_27, %c0_28, %c0_29], %70 {strides = array<i32>} : memref<1x32x32xf32, #tpu.memory_space<vmem>>, vector<1x32x32xf32>,
    return
  }
  func.func @transform_0(%arg0: i32) -> (i32, i32, i32) {
    %c0_i32 = arith.constant 0 : i32
    %c0_i32_0 = arith.constant 0 : i32
    %c0_i32_1 = arith.constant 0 : i32
    return %arg0, %c0_i32, %c0_i32_0 : i32, i32, i32
  }
  func.func @transform_1(%arg0: i32) -> (i32, i32, i32) {
    %c0_i32 = arith.constant 0 : i32
    %c0_i32_0 = arith.constant 0 : i32
    %c0_i32_1 = arith.constant 0 : i32
    return %arg0, %c0_i32, %c0_i32_0 : i32, i32, i32
  }
  func.func @transform_2(%arg0: i32) -> (i32, i32) {
    %c0_i32 = arith.constant 0 : i32
    %c0_i32_0 = arith.constant 0 : i32
    %c0_i32_1 = arith.constant 0 : i32
    return %c0_i32, %c0_i32_0 : i32, i32
  }
  func.func @transform_3(%arg0: i32) -> (i32, i32) {
    %c0_i32 = arith.constant 0 : i32
    %c0_i32_0 = arith.constant 0 : i32
    %c0_i32_1 = arith.constant 0 : i32
    return %c0_i32, %c0_i32_0 : i32, i32
  }
  func.func @transform_4(%arg0: i32) -> (i32, i32) {
    %c0_i32 = arith.constant 0 : i32
    %c0_i32_0 = arith.constant 0 : i32
    %c0_i32_1 = arith.constant 0 : i32
    return %c0_i32, %c0_i32_0 : i32, i32
  }
  func.func @transform_5(%arg0: i32) -> (i32, i32) {
    %c0_i32 = arith.constant 0 : i32
    %c0_i32_0 = arith.constant 0 : i32
    %c0_i32_1 = arith.constant 0 : i32
    return %c0_i32, %c0_i32_0 : i32, i32
  }
  func.func @transform_6(%arg0: i32) -> (i32, i32) {
    %c0_i32 = arith.constant 0 : i32
    %c0_i32_0 = arith.constant 0 : i32
    %c0_i32_1 = arith.constant 0 : i32
    return %c0_i32, %c0_i32_0 : i32, i32
  }
  func.func @transform_7(%arg0: i32) -> (i32, i32) {
    %c0_i32 = arith.constant 0 : i32
    %c0_i32_0 = arith.constant 0 : i32
    %c0_i32_1 = arith.constant 0 : i32
    return %c0_i32, %c0_i32_0 : i32, i32
  }
  func.func @transform_8(%arg0: i32) -> (i32, i32) {
    %c0_i32 = arith.constant 0 : i32
    %c0_i32_0 = arith.constant 0 : i32
    %c0_i32_1 = arith.constant 0 : i32
    return %c0_i32, %c0_i32_0 : i32, i32
  }
  func.func @transform_9(%arg0: i32) -> (i32, i32, i32) {
    %c0_i32 = arith.constant 0 : i32
    %c0_i32_0 = arith.constant 0 : i32
    %c0_i32_1 = arith.constant 0 : i32
    return %arg0, %c0_i32, %c0_i32_0 : i32, i32, i32
  }
}

</mosaic_0001>

<bundles_post_ra>
// kernel: tpu_custom_call.1
= control target key start
LH: loop header
LB: loop body
LE: loop exit
PB: predicated region body
PF: predicated region fallthrough
CT: control target
= control target key end

     0   :  { %14 = vsyncpa [#allocation3], 0  ;;  %s4456_s0 = inlined_call_operand.hbm [shape: f32[1,32,32], index: 0, kind: input, shape index: {}]   ;;  %s4457_s1 = inlined_call_operand.hbm [shape: f32[1,32,34], index: 1, kind: input, shape index: {}]   ;;  %s4458_s2 = inlined_call_operand.hbm [shape: bf16[32,288], index: 2, kind: input, shape index: {}]   ;;  %s4459_s3 = inlined_call_operand.vmem [shape: bf16[34,64], index: 3, kind: input, shape index: {}]   ;;  %s4460_s4 = inlined_call_operand.vmem [shape: bf16[64,160], index: 4, kind: input, shape index: {}]   ;;  %s4461_s5 = inlined_call_operand.vmem [shape: bf16[128,32], index: 5, kind: input, shape index: {}]   ;;  %s4462_s6 = inlined_call_operand.vmem [shape: f32[1,64], index: 6, kind: input, shape index: {}]   ;;  %s4463_s7 = inlined_call_operand.vmem [shape: f32[1,128], index: 7, kind: input, shape index: {}]   ;;  %s4464_s8 = inlined_call_operand.vmem [shape: f32[1,32], index: 8, kind: input, shape index: {}]   ;;  %s4465_s9 = inlined_call_operand.hbm [shape: f32[1,32,32], index: 9, kind: output, shape index: {}]  }
   0x1   :  { %15 = vsyncpa [#allocation6], 0 }
   0x2   :  { %16 = vsyncpa [#allocation4], 0  ;;  %s3178_s30 = smov [#allocation5]   ;;  %s3179_s11 = smov [#allocation2]  }
   0x3   :  { %s34_s10 = sshll.u32 %s3178_s30, 4  ;;  %s22_s12 = sshll.u32 %s3179_s11, 4  ;;  %s35_s10 = int_to_ptr.vmem [resolvable:$true] %s34_s10  ;;  %s3238_s12 = int_to_ptr.vmem [resolvable:$true] %s22_s12 }
   0x4   :  { %s3084_s15 = scalar_lea.hbm %s4457_s1, 512 }
   0x5   :  { %p3085_p0 = scmp.ne.s32.totalorder %s4457_s1, %s3084_s15  ;;  %p3088_p1 = scmp.lt.u32.totalorder %s3084_s15, %s4457_s1 }
   0x7   :  { %p3090_p2 = pnand %p3088_p1, %p3085_p0 }
   0x9   :  { %3093 = shalt.err (!%p3090_p2)
}
   0xa   :  { %s3094_s20 = scalar_lea.vmem %s35_s10, 512  ;;  %p3099_p4 = scmp.lt.s32.totalorder %s35_s10, %s35_s10 }
   0xb   :  { %p3095_p3 = scmp.ne.s32.totalorder %s35_s10, %s3094_s20  ;;  %p3100_p5 = scmp.lt.s32.totalorder %s3094_s20, %s3094_s20 }
   0xd   :  { %p3101_p6 = por %p3100_p5, %p3099_p4 }
   0xf   :  { %p3102_p7 = pnand %p3101_p6, %p3095_p3 }
  0x11   :  { %3105 = shalt.err (!%p3102_p7)
}
  0x12   :  { %s3180_s21 = smov 128   ;;  %s3181_s22 = smov 8  }
  0x13   :  { %40 = dma.hbm_to_vmem [thread:$0]  %s4457_s1, 512, %s35_s10, [#allocation6], %s3180_s21, %s3180_s21, %s3181_s22  }
  0x14   :  { %s3106_s27 = scalar_lea.hbm %s4456_s0, 512 }
  0x15   :  { %p3107_p8 = scmp.ne.s32.totalorder %s4456_s0, %s3106_s27  ;;  %p3110_p9 = scmp.lt.u32.totalorder %s3106_s27, %s4456_s0 }
  0x17   :  { %p3112_p10 = pnand %p3110_p9, %p3107_p8 }
  0x19   :  { %3115 = shalt.err (!%p3112_p10)
}
  0x1a   :  { %s3116_s13 = scalar_lea.vmem %s3238_s12, 512  ;;  %p3121_p12 = scmp.lt.s32.totalorder %s3238_s12, %s3238_s12 }
  0x1b   :  { %p3117_p11 = scmp.ne.s32.totalorder %s3238_s12, %s3116_s13  ;;  %p3122_p13 = scmp.lt.s32.totalorder %s3116_s13, %s3116_s13 }
  0x1d   :  { %p3123_p0 = por %p3122_p13, %p3121_p12 }
  0x1f   :  { %p3124_p1 = pnand %p3123_p0, %p3117_p11 }
  0x21   :  { %3127 = shalt.err (!%p3124_p1)
}
  0x22   :  { %28 = dma.hbm_to_vmem [thread:$0]  %s4456_s0, 512, %s3238_s12, [#allocation3], %s3180_s21, %s3180_s21, %s3181_s22  }
  0x23   :  { %s3182_s14 = smov [#allocation7]   ;;  %s3128_s18 = scalar_lea.hbm %s4458_s2, 768 }
  0x24   :  { %s46_s15 = sshll.u32 %s3182_s14, 4  ;;  %p3129_p2 = scmp.ne.s32.totalorder %s4458_s2, %s3128_s18  ;;  %s47_s15 = int_to_ptr.vmem [resolvable:$true] %s46_s15 }
  0x25   :  { %p3132_p3 = scmp.lt.u32.totalorder %s3128_s18, %s4458_s2 }
  0x27   :  { %p3134_p4 = pnand %p3132_p3, %p3129_p2 }
  0x29   :  { %3137 = shalt.err (!%p3134_p4)
}
  0x2a   :  { %s3138_s25 = scalar_lea.vmem %s47_s15, 768  ;;  %p3143_p6 = scmp.lt.s32.totalorder %s47_s15, %s47_s15 }
  0x2b   :  { %p3139_p5 = scmp.ne.s32.totalorder %s47_s15, %s3138_s25  ;;  %p3144_p7 = scmp.lt.s32.totalorder %s3138_s25, %s3138_s25 }
  0x2d   :  { %p3145_p8 = por %p3144_p7, %p3143_p6 }
  0x2f   :  { %p3146_p9 = pnand %p3145_p8, %p3139_p5 }
  0x31   :  { %3149 = shalt.err (!%p3146_p9)
}
  0x32   :  { %s3183_s0 = smov 192   ;;  %s3184_s12 = smov 12  }
  0x33   :  { %52 = dma.hbm_to_vmem [thread:$0]  %s4458_s2, 768, %s47_s15, [#allocation6], %s3183_s0, %s3183_s0, %s3184_s12  }
  0x34   :  { %3172 = dma.done.wait [#allocation3], 512  }
  0x35   :  { %3173 = vsyncadd [#allocation3], 4294966784 }
  0x36   :  { %3174 = dma.done.wait [#allocation6], 1280  }
  0x37   :  { %3175 = vsyncadd [#allocation6], 4294966016  ;;  %v4466_v0 = vmov 0   ;;  %v2925_v1 = vld [vmem:[#allocation7 + $0x4] ss:$12 sps:$4 sm:$0xff]   ;;  %v76_v6 = vld [vmem:[#allocation2 + $0x8] sm:$0xff]  ;;  %v357_v33 = vlaneseq }
  0x38   :  { %166 = vmatprep.mubr.bf16.mxu1 %v4466_v0  ;;  %918 = vmatprep.mubr.bf16.mxu0 %v4466_v0  ;;  %v2927_v2 = vld [vmem:[#allocation7] ss:$12 sps:$4 sm:$0xff]   ;;  %v2928_v3 = vld [vmem:[#allocation7 + $0x1c] ss:$12 sps:$4 sm:$0xff]   ;;  %v2930_v4 = vld [vmem:[#allocation7 + $0x18] ss:$12 sps:$4 sm:$0xff]  }
  0x39   :  { %134 = vmatprep.subr.bf16.mxu1 %v2925_v1  ;;  %v75_v5 = vld [vmem:[#allocation2] sm:$0xff]  ;;  %v2931_v7 = vld [vmem:[#allocation7 + $0x8] ss:$12 sps:$4 sm:$0xff]   ;;  %vm127_vm0 = vcmask 261120   ;;  %v78_v11 = vld [vmem:[#allocation2 + $0x18] sm:$0xff]  ;;  %vm278_vm1 = vcmask 277504  }
  0x3a   :  { %135 = vmatpush1.bf16.msra.mxu1 %v2927_v2  ;;  %v79_v8 = vpack.c.bf16 %v76_v6, %v75_v5  ;;  %v2932_v9 = vld [vmem:[#allocation7 + $0x20] ss:$12 sps:$4 sm:$0xff]   ;;  %v77_v10 = vld [vmem:[#allocation2 + $0x10] sm:$0xff]  ;;  %vm285_vm2 = vcmask 1040384   ;;  %v84_v20 = vld [vmem:[#allocation5 + $0x18] sm:$0xff]  ;;  %v358_v35 = vshrl.u32 %v357_v33, 7 }
  0x3b   :  { %136 = vmatprep.subr.bf16.mxu1 %v2928_v3  ;;  %v2933_v12 = vld [vmem:[%s4459_s3] sm:$0xff]   ;;  %v80_v13 = vpack.c.bf16 %v78_v11, %v77_v10  ;;  %v82_v15 = vld [vmem:[#allocation5 + $0x8] sm:$0xff]  ;;  %v2935_v18 = vld [vmem:[%s4459_s3 + $0x10] ss:$0 sps:$4 sm:$0x11]   ;;  %vm837_vm3 = vcmask 523264  }
  0x3c   :  { %v81_v14 = vld [vmem:[#allocation5] sm:$0xff]  ;;  %v2934_v17 = vld [vmem:[%s4459_s3 + $0x8] sm:$0xff]   ;;  %v83_v19 = vld [vmem:[#allocation5 + $0x10] sm:$0xff]  ;;  %v287_v21 = vsel %vm285_vm2, %v2935_v18, 0  ;;  %v3186_v31 = vmov 1966171168  }
  0x3d   :  { %v85_v16 = vpack.c.bf16 %v82_v15, %v81_v14  ;;  %v86_v22 = vpack.c.bf16 %v84_v20, %v83_v19  ;;  %v2936_v23 = vld [vmem:[%s4460_s4 + $0x4] ss:$8 sps:$4 sm:$0xff]   ;;  %v2938_v24 = vld [vmem:[%s4460_s4] ss:$8 sps:$4 sm:$0xff]   ;;  %v2939_v25 = vld [vmem:[%s4460_s4 + $0x14] ss:$8 sps:$4 sm:$0xff]   ;;  %v355_v32 = vunpack.c.l.s4 %v3186_v31 }
  0x3e   :  { %137 = vmatpush1.bf16.msra.mxu1 %v2930_v4  ;;  %886 = vmatprep.subr.bf16.mxu0 %v2936_v23  ;;  %v2941_v26 = vld [vmem:[%s4460_s4 + $0x10] ss:$8 sps:$4 sm:$0xff]   ;;  %v2942_v27 = vld [vmem:[%s4460_s4 + $0x24] ss:$8 sps:$4 sm:$0xff]   ;;  %v2944_v28 = vld [vmem:[%s4460_s4 + $0x20] ss:$8 sps:$4 sm:$0xff]  }
  0x3f   :  { %2848 = vmatprep.subr.bf16.mxu1 %v2931_v7  ;;  %887 = vmatpush1.bf16.msra.mxu0 %v2938_v24  ;;  %v2945_v29 = vld [vmem:[%s4460_s4 + $0x34] ss:$8 sps:$4 sm:$0xff]   ;;  %v2947_v30 = vld [vmem:[%s4460_s4 + $0x30] ss:$8 sps:$4 sm:$0xff]   ;;  %v356_v34 = vunpack.c.0.s8 %v355_v32  ;;  %v2775_v36 = vld [vmem:[%s4463_s7] ss:$0 sm:$0xff] }
  0x40   :  { %888 = vmatprep.subr.bf16.mxu0 %v2939_v25  ;;  %v3337_v46 = vsub.s32 0, %v358_v35  ;;  %vm2704_vm4 = vcmask 1041409   ;;  %vm2706_vm5 = vcmask 1042434   ;;  %vm2708_vm6 = vcmask 1043459  }
  0x41   :  { %2771 = vmatmul.mubr.msk.bf16.vlgmr.msra.gmra.mrb[0].mxu1 %vm127_vm0, %v79_v8  ;;  %v3330_v37 = vsub.s32 %v356_v34, %v358_v35  ;;  %vm2710_vm7 = vcmask 1044484   ;;  %vm2712_vm8 = vcmask 1045509   ;;  %vm2714_vm9 = vcmask 1046534  }
  0x42   :  { %2849 = vmatpush3.bf16.msra.mxu1 %v2931_v7  ;;  %176 = vmatprep.mubr.bf16.mxu1 %v4466_v0  ;;  %vm2716_vm10 = vcmask 1047559  }
  0x43   :  { %2850 = vmatprep.subr.bf16.mxu1 %v2932_v9  ;;  %889 = vmatpush1.bf16.msra.mxu0 %v2941_v26 }
  0x44   :  { %890 = vmatprep.subr.bf16.mxu0 %v2942_v27 }
  0x46   :  { %2851 = vmatpush3.bf16.msra.mxu1 %v2932_v9 }
  0x47   :  { %2856 = vmatprep.subr.bf16.mxu1 %v2933_v12  ;;  %891 = vmatpush1.bf16.msra.mxu0 %v2944_v28 }
  0x48   :  { %892 = vmatprep.subr.bf16.mxu0 %v2945_v29 }
  0x49   :  { %2772 = vmatmul.mubr.msk.bf16.gmra.mrb[4].mxu1 %vm127_vm0, %v80_v13 }
  0x4a   :  { %2852 = vmatprep.mubr.msk.bf16.mxu1 %vm127_vm0, %v79_v8 }
  0x4b   :  { %893 = vmatpush1.bf16.msra.mxu0 %v2947_v30 }
  0x51   :  { %2853 = vmatmul.mubr.msk.bf16.vlgmr.msra.gmra.mrb[8].mxu1 %vm127_vm0, %v80_v13 }
  0x52   :  { %2857 = vmatpush3.bf16.msra.mxu1 %v2933_v12  ;;  %2862 = vmatprep.mubr.msk.bf16.mxu1 %vm278_vm1, %v85_v16 }
  0x53   :  { %2858 = vmatprep.subr.bf16.mxu1 %v2934_v17 }
  0x56   :  { %2859 = vmatpush3.bf16.msra.mxu1 %v2934_v17 }
  0x57   :  { %2914 = vmatprep.subr.msk.bf16.mxu1 %vm285_vm2, %v2935_v18 }
  0x5a   :  { %2861 = vmatpush3.bf16.msra.mxu1 %v287_v21 }
  0x5d   :  { %2863 = vmatmul.mubr.msk.bf16.vlgmr.msra.gmra.mrb[12].mxu1 %vm278_vm1, %v86_v22 }
 0x114   :  { %v168_v38 = vpop.f32.mrb[0].mxu1 }
 0x115   :  { %v243_v39 = vadd.f32 %v2775_v36, %v168_v38  ;;  %v3332_v40 = vpop.f32.mrb[1].mxu1 }
 0x116   :  { %v172_v41 = vpop.f32.mrb[2].mxu1 }
 0x117   :  { %v1083_v42 = vcombine.high %v243_v39, %v243_v39  ;;  %v1090_v43 = vrot.slane %v243_v39, %v3330_v37  ;;  %v244_v44 = vadd.f32 %v2775_v36, %v172_v41  ;;  %v3335_v45 = vpop.f32.mrb[3].mxu1  ;;  %v2949_v39 = vld [vmem:[%s4461_s5 + $0x8] sm:$0xff]  }
 0x119   :  { %v1097_v47 = vrot.slane %v1083_v42, %v3330_v37  ;;  %v1098_v48 = vcombine.high %v1090_v43, %v1090_v43  ;;  %v1106_v49 = vrot.slane %v1090_v43, %v3330_v37  ;;  %v1132_v50 = vcombine.high %v244_v44, %v244_v44 }
 0x11a   :  { %v1139_v51 = vrot.slane %v244_v44, %v3330_v37 }
 0x11b   :  { %v1099_v52 = vcombine.high %v1097_v47, %v1097_v47  ;;  %v1282_v53 = vrot.slane %v1106_v49, %v3337_v46  ;;  %v1120_v54 = vrot.slane %v1098_v48, %v3330_v37  ;;  %v1146_v55 = vrot.slane %v1132_v50, %v3330_v37 }
 0x11c   :  { %v178_v56 = vpop.f32.mrb[4].mxu1  ;;  %v1128_v57 = vcombine.high %v1106_v49, %v1106_v49  ;;  %v1113_v58 = vrot.slane %v1097_v47, %v3330_v37  ;;  %v1147_v59 = vcombine.high %v1139_v51, %v1139_v51  ;;  %v1155_v6 = vrot.slane %v1139_v51, %v3330_v37 }
 0x11d   :  { %v245_v60 = vadd.f32 %v2775_v36, %v178_v56  ;;  %v3346_v61 = vpop.f32.mrb[5].mxu1  ;;  %v3349_v62 = vsub.f32 %v1282_v53, %v3332_v40  ;;  %v1286_v63 = vrot.slane %v1120_v54, %v3337_v46  ;;  %v1130_v3 = vcombine.high %v1120_v54, %v1120_v54 }
 0x11e   :  { %v182_v1 = vpop.f32.mrb[6].mxu1  ;;  %v3353_v2 = vrot.slane %v1128_v57, %v3337_v46  ;;  %v1298_v4 = vrot.slane %v1113_v58, %v3337_v46  ;;  %v1127_v5 = vrot.slane %v1099_v52, %v3330_v37  ;;  %v1129_v18 = vcombine.high %v1113_v58, %v1113_v58 }
 0x11f   :  { %v1181_v7 = vcombine.high %v245_v60, %v245_v60  ;;  %v3358_v8 = vadd.f32 %v2775_v36, %v182_v1  ;;  %v3360_v9 = vpop.f32.mrb[7].mxu1  ;;  %v3363_v10 = vsub.f32 %v1286_v63, %v3332_v40  ;;  %v3368_v12 = vrot.slane %v1130_v3, %v3337_v46 }
 0x120   :  { %v3371_v13 = vsub.f32 %v1298_v4, %v3332_v40  ;;  %v1302_v14 = vrot.slane %v1127_v5, %v3337_v46  ;;  %v1188_v15 = vrot.slane %v245_v60, %v3330_v37  ;;  %v1131_v20 = vcombine.high %v1127_v5, %v1127_v5 }
 0x121   :  { %v1195_v19 = vrot.slane %v1181_v7, %v3330_v37  ;;  %v1314_v21 = vrot.slane %v1155_v6, %v3337_v46  ;;  %v1148_v22 = vcombine.high %v1146_v55, %v1146_v55  ;;  %v3384_v23 = vrot.slane %v3358_v8, %v3330_v37 }
 0x122   :  { %v3378_v17 = vsub.f32 %v1302_v14, %v3332_v40  ;;  %v3389_v25 = vrot.slane %v1129_v18, %v3337_v46  ;;  %v1169_v26 = vrot.slane %v1147_v59, %v3330_v37  ;;  %v1204_v27 = vrot.slane %v1188_v15, %v3330_v37 }
 0x123   :  { %v3396_v29 = vrot.slane %v1131_v20, %v3337_v46  ;;  %v3399_v30 = vsub.f32 %v1314_v21, %v3335_v45  ;;  %v1196_v31 = vcombine.high %v1188_v15, %v1188_v15  ;;  %v1177_v35 = vcombine.high %v1155_v6, %v1155_v6  ;;  %v2782_v15 = vld [vmem:[%s4462_s6] ss:$0 sm:$0xff] }
 0x124   :  { %v3386_v24 = vpop.f32.mrb[8].mxu1  ;;  %v1318_v34 = vrot.slane %v1169_v26, %v3337_v46  ;;  %v1197_v36 = vcombine.high %v1195_v19, %v1195_v19  ;;  %v1179_v41 = vcombine.high %v1169_v26, %v1169_v26  ;;  %v1162_v42 = vrot.slane %v1146_v55, %v3330_v37 }
 0x125   :  { %v3393_v28 = vpop.f32.mrb[9].mxu1  ;;  %v3413_v43 = vrot.slane %v3384_v23, %v3330_v37  ;;  %v3419_v47 = vrot.slane %v1177_v35, %v3337_v46  ;;  %v1176_v48 = vrot.slane %v1148_v22, %v3330_v37  ;;  %v1346_v52 = vrot.slane %v1204_v27, %v3337_v46 }
 0x126   :  { %v3401_v32 = vpop.f32.mrb[10].mxu1  ;;  %v3416_v44 = vsub.f32 %v1318_v34, %v3335_v45  ;;  %v3423_v49 = vrot.slane %v1179_v41, %v3337_v46  ;;  %v1330_v50 = vrot.slane %v1162_v42, %v3337_v46  ;;  %v1178_v51 = vcombine.high %v1162_v42, %v1162_v42 }
 0x127   :  { %4471 = vst [vmem:[#allocation12_spill] sm:$0xff] %v3401_v32  ;;  %v3406_v38 = vpop.f32.mrb[11].mxu1  ;;  %v1334_v54 = vrot.slane %v1176_v48, %v3337_v46  ;;  %v1180_v55 = vcombine.high %v1176_v48, %v1176_v48  ;;  %v1218_v56 = vrot.slane %v1196_v31, %v3330_v37  ;;  %v3440_v60 = vsub.f32 %v1346_v52, %v3346_v61 }
 0x128   :  { %v3434_v58 = vsub.f32 %v1330_v50, %v3335_v45  ;;  %v3437_v59 = vrot.slane %v1178_v51, %v3337_v46  ;;  %v1226_v4 = vcombine.high %v1204_v27, %v1204_v27  ;;  %v1211_v7 = vrot.slane %v1195_v19, %v3330_v37 }
 0x129   :  { %v3443_v63 = vsub.f32 %v1334_v54, %v3335_v45  ;;  %v3446_v1 = vrot.slane %v1180_v55, %v3337_v46  ;;  %v1350_v3 = vrot.slane %v1218_v56, %v3337_v46  ;;  %v1228_v6 = vcombine.high %v1218_v56, %v1218_v56 }
 0x12a   :  { %v3453_v14 = vrot.slane %v1197_v36, %v3330_v37  ;;  %v3464_v21 = vrot.slane %v1226_v4, %v3337_v46  ;;  %v1378_v22 = vrot.slane %v3413_v43, %v3337_v46  ;;  %v1362_v26 = vrot.slane %v1211_v7, %v3337_v46 }
 0x12b   :  { %v3461_v20 = vsub.f32 %v1350_v3, %v3346_v61  ;;  %v3469_v19 = vrot.slane %v1228_v6, %v3337_v46  ;;  %v1227_v31 = vcombine.high %v1211_v7, %v1211_v7 }
 0x12c   :  { %4473 = vst [vmem:[#allocation14_spill] sm:$0xff] %v3464_v21  ;;  %v1366_v27 = vrot.slane %v3453_v14, %v3337_v46  ;;  %v3479_v36 = vsub.f32 %v1378_v22, %v3360_v9  ;;  %v3489_v50 = vsub.f32 %v1362_v26, %v3346_v61 }
 0x12d   :  { %4472 = vst [vmem:[#allocation13_spill] sm:$0xff] %v3461_v20  ;;  %4474 = vst [vmem:[#allocation15_spill] sm:$0xff] %v3469_v19  ;;  %v3498_v55 = vrot.slane %v1227_v31, %v3337_v46 }
 0x12e   :  { %4475 = vst [vmem:[#allocation16_spill] sm:$0xff] %v3479_v36  ;;  %4476 = vst [vmem:[#allocation17_spill] sm:$0xff] %v3489_v50  ;;  %v3492_v51 = vsub.f32 %v1366_v27, %v3346_v61 }
 0x12f   :  { %4478 = vst [vmem:[#allocation19_spill] sm:$0xff] %v3498_v55 }
 0x130   :  { %v3474_v34 = vpop.f32.mrb[12].mxu1  ;;  %4477 = vst [vmem:[#allocation18_spill] sm:$0xff] %v3492_v51 }
 0x131   :  { %v3481_v41 = vpop.f32.mrb[13].mxu1  ;;  %v3484_v42 = vadd.f32 %v3474_v34, %v2782_v15 }
 0x132   :  { %v3494_v52 = vpop.f32.mrb[14].mxu1  ;;  %v345_v54 = vadd.f32 %v2782_v15, %v3481_v41 }
 0x133   :  { %v3500_v56 = vpop.f32.mrb[15].mxu1  ;;  %v3503_v3 = vadd.f32 %v3494_v52, %v2782_v15  ;;  %v458_v48 = vrot.slane %v3484_v42, %v3330_v37 }
 0x134   :  { %v360_v4 = vrot.slane %v345_v54, %v3330_v37  ;;  %v353_v6 = vcombine.high %v345_v54, %v345_v54  ;;  %v3507_v7 = vadd.f32 %v2782_v15, %v3500_v56  ;;  %v1230_v54 = vcombine.high %v3358_v8, %v3358_v8 }
 0x135   :  { %v466_v16 = vcombine.high %v458_v48, %v458_v48  ;;  %v3540_v0 = vrot.slane %v458_v48, %v3330_v37  ;;  %v1229_v48 = vcombine.high %v3453_v14, %v3453_v14 }
 0x136   :  { %v368_v26 = vcombine.high %v360_v4, %v360_v4  ;;  %v376_v27 = vrot.slane %v360_v4, %v3330_v37  ;;  %v367_v31 = vrot.slane %v353_v6, %v3330_v37  ;;  %v409_v15 = vrot.slane %v3507_v7, %v3330_v37 }
 0x137   :  { %v496_v19 = vcombine.high %v3540_v0, %v3540_v0 }
 0x138   :  { %v390_v35 = vrot.slane %v368_v26, %v3330_v37  ;;  %v552_v18 = vrot.slane %v376_v27, %v3337_v46  ;;  %v369_v5 = vcombine.high %v367_v31, %v367_v31  ;;  %v398_v22 = vcombine.high %v376_v27, %v376_v27  ;;  %v2948_v26 = vld [vmem:[%s4461_s5] sm:$0xff]  }
 0x139   :  { %v383_v53 = vrot.slane %v367_v31, %v3330_v37  ;;  %2866 = vmatprep.subr.bf16.mxu1 %v2948_v26  ;;  %v1245_v31 = vcombine.high %v3384_v23, %v3384_v23  ;;  %v3547_v55 = vrot.slane %v409_v15, %v3330_v37  ;;  %v488_v23 = vrot.slane %v466_v16, %v3330_v37 }
 0x13a   :  { %v556_v57 = vrot.slane %v390_v35, %v3337_v46  ;;  %v709_v4 = vsub.f32 %v552_v18, %v3481_v41  ;;  %v400_v6 = vcombine.high %v390_v35, %v390_v35  ;;  %v397_v33 = vrot.slane %v369_v5, %v3330_v37  ;;  %2867 = vmatpush3.bf16.msra.mxu1 %v2948_v26 }
 0x13b   :  { %v417_v18 = vcombine.high %v409_v15, %v409_v15  ;;  %v3534_v35 = vrot.slane %v1230_v54, %v3330_v37  ;;  %v560_v11 = vrot.slane %v398_v22, %v3337_v46  ;;  %2868 = vmatprep.subr.bf16.mxu1 %v2949_v39  ;;  %v568_v26 = vrot.slane %v383_v53, %v3337_v46 }
 0x13c   :  { %v710_v8 = vsub.f32 %v556_v57, %v3481_v41  ;;  %v564_v27 = vrot.slane %v400_v6, %v3337_v46  ;;  %v741_v5 = vmax.f32 %v709_v4, 0.0  ;;  %v399_v57 = vcombine.high %v383_v53, %v383_v53  ;;  %v2950_v6 = vld [vmem:[%s4461_s5 + $0x10] sm:$0xff]  }
 0x13d   :  { %v401_v32 = vcombine.high %v397_v33, %v397_v33  ;;  %v572_v54 = vrot.slane %v397_v33, %v3337_v46  ;;  %v616_v33 = vrot.slane %v3540_v0, %v3337_v46  ;;  %v451_v15 = vcombine.high %v3484_v42, %v3484_v42 }
 0x13e   :  { %v742_v36 = vmax.f32 %v710_v8, 0.0  ;;  %v712_v4 = vsub.f32 %v564_v27, %v3481_v41  ;;  %v439_v8 = vrot.slane %v417_v18, %v3330_v37  ;;  %2869 = vmatpush3.bf16.msra.mxu1 %v2949_v39  ;;  %v3562_v16 = vrot.slane %v1245_v31, %v3330_v37  ;;  %v2951_v27 = vld [vmem:[%s4461_s5 + $0x18] sm:$0xff]  }
 0x13f   :  { %v711_v14 = vsub.f32 %v560_v11, %v3481_v41  ;;  %v576_v53 = vrot.slane %v399_v57, %v3337_v46  ;;  %2870 = vmatprep.subr.bf16.mxu1 %v2950_v6  ;;  %v4479_v18 = vmov 0   ;;  %v714_v39 = vsub.f32 %v572_v54, %v3481_v41 }
 0x140   :  { %v773_v22 = vpack.c.bf16 %v742_v36, %v741_v5  ;;  %v580_v36 = vrot.slane %v401_v32, %v3337_v46  ;;  %v584_v42 = vrot.slane %v3547_v55, %v3337_v46  ;;  %v402_v31 = vcombine.high %v3507_v7, %v3507_v7 }
 0x141   :  { %v3578_v11 = vrot.slane %v1229_v48, %v3337_v46  ;;  %v744_v5 = vmax.f32 %v712_v4, 0.0  ;;  %v713_v32 = vsub.f32 %v568_v26, %v3481_v41  ;;  %v588_v57 = vrot.slane %v439_v8, %v3337_v46 }
 0x142   :  { %2791 = vmatmul.mubr.msk.bf16.vlgmr.msra.gmra.mrb[0].mxu0 %vm837_vm3, %v773_v22  ;;  %v620_v22 = vrot.slane %v488_v23, %v3337_v46  ;;  %v725_v51 = vsub.f32 %v616_v33, %v3474_v34  ;;  %v465_v54 = vrot.slane %v451_v15, %v3330_v37  ;;  %2871 = vmatpush3.bf16.msra.mxu1 %v2950_v6  ;;  %v743_v48 = vmax.f32 %v711_v14, 0.0 }
 0x143   :  { %928 = vmatprep.mubr.bf16.mxu0 %v4479_v18  ;;  %v715_v4 = vsub.f32 %v576_v53, %v3481_v41  ;;  %v716_v26 = vsub.f32 %v580_v36, %v3481_v41  ;;  %2872 = vmatprep.subr.bf16.mxu1 %v2951_v27  ;;  %v746_v21 = vmax.f32 %v714_v39, 0.0  ;;  %v3594_v33 = vsub.f32 %v584_v42, %v3500_v56 }
 0x144   :  { %v726_v6 = vsub.f32 %v620_v22, %v3474_v34  ;;  %v507_v15 = vrot.slane %v3503_v3, %v3330_v37  ;;  %v774_v50 = vpack.c.bf16 %v744_v5, %v743_v48  ;;  %v745_v7 = vmax.f32 %v713_v32, 0.0 }
 0x145   :  { %v3600_v14 = vsub.f32 %v588_v57, %v3500_v56  ;;  %v3603_v41 = vrot.slane %v402_v31, %v3330_v37  ;;  %v449_v53 = vcombine.high %v439_v8, %v439_v8  ;;  %v757_v0 = vmax.f32 %v725_v51, 0.0 }
 0x146   :  { %v758_v36 = vmax.f32 %v726_v6, 0.0  ;;  %v498_v39 = vcombine.high %v488_v23, %v488_v23  ;;  %2873 = vmatpush3.bf16.msra.mxu1 %v2951_v27  ;;  %v3606_v42 = vmax.f32 %v715_v4, 0.0  ;;  %v3608_v22 = vmax.f32 %v716_v26, 0.0 }
 0x147   :  { %v624_v32 = vrot.slane %v496_v19, %v3337_v46  ;;  %v775_v31 = vpack.c.bf16 %v746_v21, %v745_v7  ;;  %v467_v57 = vcombine.high %v465_v54, %v465_v54  ;;  %v481_v48 = vrot.slane %v465_v54, %v3330_v37 }
 0x148   :  { %v3615_v51 = vpack.c.bf16 %v758_v36, %v757_v0  ;;  %v628_v23 = vrot.slane %v498_v39, %v3337_v46  ;;  %v3624_v19 = vrot.slane %v449_v53, %v3337_v46  ;;  %v515_v7 = vcombine.high %v507_v15, %v507_v15 }
 0x149   :  { %v727_v27 = vsub.f32 %v624_v32, %v3474_v34  ;;  %v776_v26 = vpack.c.bf16 %v3608_v22, %v3606_v42  ;;  %v495_v6 = vrot.slane %v467_v57, %v3330_v37  ;;  %v632_v0 = vrot.slane %v481_v48, %v3337_v46 }
 0x14a   :  { %2792 = vmatmul.mubr.msk.bf16.gmra.mrb[4].mxu0 %vm837_vm3, %v774_v50  ;;  %v728_v21 = vsub.f32 %v628_v23, %v3474_v34  ;;  %v497_v36 = vcombine.high %v481_v48, %v481_v48  ;;  %v523_v54 = vrot.slane %v507_v15, %v3330_v37  ;;  %v537_v53 = vrot.slane %v515_v7, %v3330_v37 }
 0x14b   :  { %938 = vmatprep.mubr.bf16.mxu0 %v4479_v18  ;;  %v3631_v39 = vmax.f32 %v727_v27, 0.0  ;;  %v636_v50 = vrot.slane %v495_v6, %v3337_v46  ;;  %v729_v23 = vsub.f32 %v632_v0, %v3474_v34  ;;  %v499_v4 = vcombine.high %v495_v6, %v495_v6 }
 0x14c   :  { %v3633_v32 = vmax.f32 %v728_v21, 0.0  ;;  %v640_v42 = vrot.slane %v497_v36, %v3337_v46  ;;  %v648_v57 = vrot.slane %v523_v54, %v3337_v46  ;;  %v652_v27 = vrot.slane %v537_v53, %v3337_v46 }
 0x14d   :  { %v545_v48 = vcombine.high %v523_v54, %v523_v54  ;;  %v730_v15 = vsub.f32 %v636_v50, %v3474_v34  ;;  %v761_v21 = vmax.f32 %v729_v23, 0.0  ;;  %v644_v7 = vrot.slane %v499_v4, %v3337_v46 }
 0x14e   :  { %v731_v0 = vsub.f32 %v640_v42, %v3474_v34  ;;  %v733_v6 = vsub.f32 %v648_v57, %v3494_v52  ;;  %v734_v36 = vsub.f32 %v652_v27, %v3494_v52  ;;  %v547_v22 = vcombine.high %v537_v53, %v537_v53 }
 0x14f   :  { %v656_v8 = vrot.slane %v545_v48, %v3337_v46  ;;  %v762_v5 = vmax.f32 %v730_v15, 0.0  ;;  %v732_v54 = vsub.f32 %v644_v7, %v3474_v34  ;;  %v500_v50 = vcombine.high %v3503_v3, %v3503_v3 }
 0x150   :  { %v765_v4 = vmax.f32 %v733_v6, 0.0  ;;  %v766_v23 = vmax.f32 %v734_v36, 0.0  ;;  %v660_v42 = vrot.slane %v547_v22, %v3337_v46  ;;  %v4480_v22 = vrot.slane %v3562_v16, %v3337_v46 }
 0x151   :  { %v735_v20 = vsub.f32 %v656_v8, %v3494_v52  ;;  %v3659_v57 = vpack.c.bf16 %v762_v5, %v761_v21  ;;  %v3661_v27 = vmax.f32 %v732_v54, 0.0  ;;  %v514_v53 = vrot.slane %v500_v50, %v3330_v37 }
 0x152   :  { %2793 = vmatmul.mubr.msk.bf16.gmra.mrb[8].mxu0 %vm837_vm3, %v775_v31  ;;  %v3653_v31 = vmax.f32 %v731_v0, 0.0  ;;  %v3666_v48 = vpack.c.bf16 %v766_v23, %v765_v4  ;;  %v736_v15 = vsub.f32 %v660_v42, %v3494_v52  ;;  %v3675_v8 = vsub.f32 %v4480_v22, %v3360_v9 }
 0x153   :  { %948 = vmatprep.mubr.bf16.mxu0 %v4479_v18  ;;  %v3669_v3 = vmax.f32 %v735_v20, 0.0  ;;  %v516_v21 = vcombine.high %v514_v53, %v514_v53  ;;  %v530_v7 = vrot.slane %v514_v53, %v3330_v37  ;;  %v4481_v0 = vcombine.high %v3413_v43, %v3413_v43 }
 0x154   :  { %v3686_v20 = vmax.f32 %v736_v15, 0.0  ;;  %v1277_v36 = vcombine.high %v3562_v16, %v3562_v16  ;;  %v1260_v54 = vrot.slane %v3534_v35, %v3330_v37  ;;  %v4482_v50 = vcombine.high %v3534_v35, %v3534_v35 }
 0x155   :  { %v3684_v6 = vrot.slane %v4481_v0, %v3337_v46  ;;  %v544_v23 = vrot.slane %v516_v21, %v3330_v37  ;;  %v664_v43 = vrot.slane %v530_v7, %v3337_v46  ;;  %v546_v42 = vcombine.high %v530_v7, %v530_v7 }
 0x156   :  { %v1274_v4 = vrot.slane %v4482_v50, %v3330_v37  ;;  %v3705_v15 = vrot.slane %v1277_v36, %v3337_v46  ;;  %v1394_v35 = vrot.slane %v1260_v54, %v3337_v46  ;;  %v1276_v34 = vcombine.high %v1260_v54, %v1260_v54 }
 0x157   :  { %v668_v22 = vrot.slane %v544_v23, %v3337_v46  ;;  %v737_v21 = vsub.f32 %v664_v43, %v3494_v52  ;;  %v548_v7 = vcombine.high %v544_v23, %v544_v23  ;;  %v672_v0 = vrot.slane %v546_v42, %v3337_v46 }
 0x158   :  { %v3715_v53 = vsub.f32 %v1394_v35, %v3360_v9  ;;  %v4485_v16 = vcombine.high %v3547_v55, %v3547_v55  ;;  %v4486_v50 = vmax.f32 %v3594_v33, 0.0  ;;  %v4487_v35 = vmax.f32 %v3600_v14, 0.0 }
 0x159   :  { %v738_v43 = vsub.f32 %v668_v22, %v3494_v52  ;;  %v676_v23 = vrot.slane %v548_v7, %v3337_v46  ;;  %v739_v42 = vsub.f32 %v672_v0, %v3494_v52  ;;  %v4488_v54 = vcombine.high %v3603_v41, %v3603_v41 }
 0x15a   :  { %2794 = vmatmul.mubr.msk.bf16.gmra.mrb[12].mxu0 %vm837_vm3, %v776_v26  ;;  %v1398_v26 = vrot.slane %v1274_v4, %v3337_v46  ;;  %4483 = vst [vmem:[#allocation20_spill] sm:$0xff] %v3715_v53  ;;  %v592_v5 = vrot.slane %v4485_v16, %v3337_v46  ;;  %v777_v53 = vpack.c.bf16 %v4487_v35, %v4486_v50  ;;  %v769_v22 = vmax.f32 %v737_v21, 0.0 }
 0x15b   :  { %958 = vmatprep.mubr.bf16.mxu0 %v4479_v18  ;;  %v1278_v55 = vcombine.high %v1274_v4, %v1274_v4  ;;  %v720_v16 = vsub.f32 %v3624_v19, %v3500_v56  ;;  %v770_v7 = vmax.f32 %v738_v43, 0.0  ;;  %v740_v0 = vsub.f32 %v676_v23, %v3494_v52 }
 0x15c   :  { %v3718_v36 = vsub.f32 %v1398_v26, %v3360_v9  ;;  %v446_v26 = vrot.slane %v4488_v54, %v3330_v37  ;;  %v432_v33 = vrot.slane %v3603_v41, %v3330_v37  ;;  %v771_v35 = vmax.f32 %v739_v42, 0.0 }
 0x15d   :  { %v3746_v50 = vrot.slane %v1278_v55, %v3337_v46  ;;  %v787_v4 = vpack.c.bf16 %v770_v7, %v769_v22  ;;  %v772_v19 = vmax.f32 %v740_v0, 0.0  ;;  %v752_v21 = vmax.f32 %v720_v16, 0.0 }
 0x15e   :  { %4484 = vst [vmem:[#allocation21_spill] sm:$0xff] %v3718_v36  ;;  %v3736_v36 = vrot.slane %v1276_v34, %v3337_v46  ;;  %v719_v34 = vsub.f32 %v592_v5, %v3500_v56  ;;  %v604_v37 = vrot.slane %v446_v26, %v3337_v46  ;;  %v600_v23 = vrot.slane %v432_v33, %v3337_v46 }
 0x15f   :  { %v1470_v52 = vsub.f32 %v3746_v50, %v3360_v9  ;;  %v788_v41 = vpack.c.bf16 %v772_v19, %v771_v35  ;;  %v450_v55 = vcombine.high %v446_v26, %v446_v26  ;;  %v448_v42 = vcombine.high %v432_v33, %v432_v33 }
 0x160   :  { %v1469_v14 = vsub.f32 %v3736_v36, %v3360_v9  ;;  %v751_v43 = vmax.f32 %v719_v34, 0.0  ;;  %v721_v5 = vsub.f32 %v600_v23, %v3500_v56 }
 0x161   :  { %v612_v16 = vrot.slane %v450_v55, %v3337_v46  ;;  %v608_v0 = vrot.slane %v448_v42, %v3337_v46  ;;  %v4489_v46 = vpack.c.bf16 %v3633_v32, %v3631_v39  ;;  %v2953_v39 = vld [vmem:[%s4461_s5 + $0x28] sm:$0xff]   ;;  %v2954_v32 = vld [vmem:[%s4461_s5 + $0x30] sm:$0xff]   ;;  %v4492_v42 = vsub.f32 %v3353_v2, %v3332_v40 }
 0x162   :  { %2795 = vmatmul.mubr.msk.bf16.gmra.mrb[16].mxu0 %vm837_vm3, %v777_v53  ;;  %v778_v54 = vpack.c.bf16 %v752_v21, %v751_v43  ;;  %v722_v53 = vsub.f32 %v604_v37, %v3500_v56  ;;  %v753_v7 = vmax.f32 %v721_v5, 0.0 }
 0x163   :  { %968 = vmatprep.mubr.bf16.mxu0 %v4479_v18  ;;  %v724_v35 = vsub.f32 %v612_v16, %v3500_v56  ;;  %v723_v26 = vsub.f32 %v608_v0, %v3500_v56  ;;  %v2952_v56 = vld [vmem:[%s4461_s5 + $0x20] sm:$0xff]  }
 0x164   :  { %v754_v22 = vmax.f32 %v722_v53, 0.0  ;;  %2874 = vmatprep.subr.bf16.mxu1 %v2952_v56 }
 0x165   :  { %v756_v19 = vmax.f32 %v724_v35, 0.0  ;;  %v755_v21 = vmax.f32 %v723_v26, 0.0  ;;  %2875 = vmatpush3.bf16.msra.mxu1 %v2952_v56 }
 0x166   :  { %v779_v34 = vpack.c.bf16 %v754_v22, %v753_v7  ;;  %2876 = vmatprep.subr.bf16.mxu1 %v2953_v39  ;;  %v4493_v7 = vsub.f32 %v3368_v12, %v3332_v40 }
 0x167   :  { %v780_v33 = vpack.c.bf16 %v756_v19, %v755_v21 }
 0x169   :  { %2877 = vmatpush3.bf16.msra.mxu1 %v2953_v39 }
 0x16a   :  { %2796 = vmatmul.mubr.msk.bf16.gmra.mrb[20].mxu0 %vm837_vm3, %v778_v54  ;;  %2878 = vmatprep.subr.bf16.mxu1 %v2954_v32 }
 0x16b   :  { %978 = vmatprep.mubr.bf16.mxu0 %v4479_v18 }
 0x16d   :  { %2879 = vmatpush3.bf16.msra.mxu1 %v2954_v32 }
 0x172   :  { %2797 = vmatmul.mubr.msk.bf16.gmra.mrb[24].mxu0 %vm837_vm3, %v779_v34 }
 0x173   :  { %988 = vmatprep.mubr.bf16.mxu0 %v4479_v18 }
 0x17a   :  { %2798 = vmatmul.mubr.msk.bf16.gmra.mrb[28].mxu0 %vm837_vm3, %v780_v33 }
 0x17b   :  { %998 = vmatprep.mubr.bf16.mxu0 %v4479_v18 }
 0x182   :  { %2799 = vmatmul.mubr.msk.bf16.gmra.mrb[32].mxu0 %vm837_vm3, %v3615_v51  ;;  %v4490_v51 = vpack.c.bf16 %v3661_v27, %v3653_v31  ;;  %v2955_v31 = vld [vmem:[%s4461_s5 + $0x38] sm:$0xff]   ;;  %v3809_v27 = vld [vmem:[%s4464_s8] ss:$0 sm:$0xff]  ;;  %s3187_s5 = smov [#allocation8]  }
 0x183   :  { %1008 = vmatprep.mubr.bf16.mxu0 %v4479_v18  ;;  %2880 = vmatprep.subr.bf16.mxu1 %v2955_v31  ;;  %s2752_s8 = sshll.u32 %s3187_s5, 4  ;;  %s2753_s8 = int_to_ptr.vmem [resolvable:$true] %s2752_s8 }
 0x184   :  { %2881 = vmatpush3.bf16.msra.mxu1 %v2955_v31  ;;  %s3150_s25 = scalar_lea.vmem %s2753_s8, 512  ;;  %p3155_p11 = scmp.lt.s32.totalorder %s2753_s8, %s2753_s8 }
 0x185   :  { %p3151_p10 = scmp.ne.s32.totalorder %s2753_s8, %s3150_s25  ;;  %p3156_p12 = scmp.lt.s32.totalorder %s3150_s25, %s3150_s25 }
 0x187   :  { %p3157_p13 = por %p3156_p12, %p3155_p11 }
 0x189   :  { %p3158_p0 = pnand %p3157_p13, %p3151_p10 }
 0x18a   :  { %2800 = vmatmul.mubr.msk.bf16.gmra.mrb[36].mxu0 %vm837_vm3, %v4489_v46 }
 0x18b   :  { %1018 = vmatprep.mubr.bf16.mxu0 %v4479_v18 }
 0x192   :  { %2801 = vmatmul.mubr.msk.bf16.gmra.mrb[40].mxu0 %vm837_vm3, %v3659_v57  ;;  %v4491_v57 = vpack.c.bf16 %v3686_v20, %v3669_v3 }
 0x193   :  { %1028 = vmatprep.mubr.bf16.mxu0 %v4479_v18 }
 0x19a   :  { %2802 = vmatmul.mubr.msk.bf16.gmra.mrb[44].mxu0 %vm837_vm3, %v4490_v51 }
 0x19b   :  { %1038 = vmatprep.mubr.bf16.mxu0 %v4479_v18 }
 0x1a2   :  { %2803 = vmatmul.mubr.msk.bf16.gmra.mrb[48].mxu0 %vm837_vm3, %v3666_v48  ;;  %v254_v48 = vadd.f32 %v3809_v27, %v3393_v28 }
 0x1a3   :  { %1048 = vmatprep.mubr.bf16.mxu0 %v4479_v18 }
 0x1aa   :  { %2804 = vmatmul.mubr.msk.bf16.gmra.mrb[52].mxu0 %vm837_vm3, %v4491_v57 }
 0x1ab   :  { %1058 = vmatprep.mubr.bf16.mxu0 %v4479_v18 }
 0x1b2   :  { %2805 = vmatmul.mubr.msk.bf16.gmra.mrb[56].mxu0 %vm837_vm3, %v787_v4 }
 0x1b3   :  { %1068 = vmatprep.mubr.bf16.mxu0 %v4479_v18 }
 0x1ba   :  { %2806 = vmatmul.mubr.msk.bf16.gmra.mrb[60].mxu0 %vm837_vm3, %v788_v41 }
 0x215   :  { %v920_v37 = vpop.f32.mrb[0].mxu0 }
 0x216   :  { %v1471_v3 = vadd.f32 %v3349_v62, %v920_v37  ;;  %v922_v20 = vpop.f32.mrb[1].mxu0 }
 0x217   :  { %v3814_v43 = vadd.f32 %v922_v20, %v254_v48  ;;  %v924_v23 = vpop.f32.mrb[2].mxu0 }
 0x218   :  { %v1472_v4 = vadd.f32 %v3363_v10, %v924_v23  ;;  %v926_v18 = vpop.f32.mrb[3].mxu0  ;;  %v1503_v41 = vmax.f32 %v1471_v3, 0.0  ;;  %v4494_v3 = vsub.f32 %v3389_v25, %v3332_v40 }
 0x219   :  { %v3817_v54 = vadd.f32 %v926_v18, %v254_v48  ;;  %v4495_v18 = vsub.f32 %v3396_v29, %v3332_v40 }
 0x21a   :  { %v1504_v53 = vmax.f32 %v1472_v4, 0.0 }
 0x21c   :  { %v1535_v55 = vpack.c.bf16 %v1504_v53, %v1503_v41 }
 0x21d   :  { %v930_v5 = vpop.f32.mrb[4].mxu0 }
 0x21e   :  { %v1473_v28 = vadd.f32 %v4492_v42, %v930_v5  ;;  %v932_v22 = vpop.f32.mrb[5].mxu0  ;;  %2882 = vmatprep.mubr.bf16.mxu1 %v1535_v55 }
 0x21f   :  { %v3822_v62 = vadd.f32 %v932_v22, %v254_v48  ;;  %v934_v16 = vpop.f32.mrb[6].mxu0 }
 0x220   :  { %v1474_v10 = vadd.f32 %v4493_v7, %v934_v16  ;;  %v936_v0 = vpop.f32.mrb[7].mxu0  ;;  %v1505_v35 = vmax.f32 %v1473_v28, 0.0  ;;  %v255_v28 = vadd.f32 %v3809_v27, %v3406_v38  ;;  %v4496_v38 = vsub.f32 %v3419_v47, %v3335_v45 }
 0x221   :  { %v3827_v34 = vadd.f32 %v936_v0, %v254_v48 }
 0x222   :  { %v1506_v26 = vmax.f32 %v1474_v10, 0.0 }
 0x224   :  { %v1536_v19 = vpack.c.bf16 %v1506_v26, %v1505_v35 }
 0x225   :  { %v940_v21 = vpop.f32.mrb[8].mxu0 }
 0x226   :  { %v1475_v33 = vadd.f32 %v3371_v13, %v940_v21  ;;  %v942_v2 = vpop.f32.mrb[9].mxu0  ;;  %2883 = vmatmul.mubr.bf16.vlgmr.msra.gmra.mrb[16].mxu1 %v1536_v19 }
 0x227   :  { %v3830_v46 = vadd.f32 %v942_v2, %v254_v48  ;;  %v944_v56 = vpop.f32.mrb[10].mxu0 }
 0x228   :  { %v1476_v51 = vadd.f32 %v3378_v17, %v944_v56  ;;  %v946_v39 = vpop.f32.mrb[11].mxu0  ;;  %v1507_v12 = vmax.f32 %v1475_v33, 0.0  ;;  %v4497_v56 = vsub.f32 %v3423_v49, %v3335_v45 }
 0x229   :  { %v3833_v32 = vadd.f32 %v946_v39, %v254_v48 }
 0x22a   :  { %v1508_v31 = vmax.f32 %v1476_v51, 0.0 }
 0x22c   :  { %v1537_v57 = vpack.c.bf16 %v1508_v31, %v1507_v12 }
 0x22d   :  { %v950_v37 = vpop.f32.mrb[12].mxu0 }
 0x22e   :  { %v1477_v20 = vadd.f32 %v4494_v3, %v950_v37  ;;  %v952_v23 = vpop.f32.mrb[13].mxu0  ;;  %2886 = vmatprep.mubr.bf16.mxu1 %v1537_v57 }
 0x22f   :  { %v3838_v13 = vadd.f32 %v952_v23, %v254_v48  ;;  %v954_v4 = vpop.f32.mrb[14].mxu0 }
 0x230   :  { %v1478_v17 = vadd.f32 %v4495_v18, %v954_v4  ;;  %v956_v41 = vpop.f32.mrb[15].mxu0  ;;  %v1509_v55 = vmax.f32 %v1477_v20, 0.0 }
 0x231   :  { %v3843_v53 = vadd.f32 %v956_v41, %v254_v48 }
 0x232   :  { %v1510_v5 = vmax.f32 %v1478_v17, 0.0 }
 0x234   :  { %v1538_v42 = vpack.c.bf16 %v1510_v5, %v1509_v55 }
 0x235   :  { %v960_v25 = vpop.f32.mrb[16].mxu0 }
 0x236   :  { %v1479_v22 = vadd.f32 %v3399_v30, %v960_v25  ;;  %v962_v16 = vpop.f32.mrb[17].mxu0  ;;  %2887 = vmatmul.mubr.bf16.gmra.mrb[20].mxu1 %v1538_v42  ;;  %v4498_v42 = vsub.f32 %v3437_v59, %v3335_v45 }
 0x237   :  { %v3848_v7 = vadd.f32 %v962_v16, %v255_v28  ;;  %v964_v10 = vpop.f32.mrb[18].mxu0 }
 0x238   :  { %v1480_v40 = vadd.f32 %v3416_v44, %v964_v10  ;;  %v966_v29 = vpop.f32.mrb[19].mxu0  ;;  %v1511_v48 = vmax.f32 %v1479_v22, 0.0  ;;  %v4499_v10 = vsub.f32 %v3446_v1, %v3335_v45 }
 0x239   :  { %v3851_v0 = vadd.f32 %v966_v29, %v255_v28 }
 0x23a   :  { %v1512_v35 = vmax.f32 %v1480_v40, 0.0 }
 0x23c   :  { %v1539_v26 = vpack.c.bf16 %v1512_v35, %v1511_v48 }
 0x23d   :  { %v970_v19 = vpop.f32.mrb[20].mxu0 }
 0x23e   :  { %v1481_v21 = vadd.f32 %v4496_v38, %v970_v19  ;;  %v972_v33 = vpop.f32.mrb[21].mxu0  ;;  %2890 = vmatprep.mubr.bf16.mxu1 %v1539_v26  ;;  %v256_v19 = vadd.f32 %v3386_v24, %v3809_v27 }
 0x23f   :  { %v3856_v30 = vadd.f32 %v972_v33, %v255_v28  ;;  %v974_v2 = vpop.f32.mrb[22].mxu0 }
 0x240   :  { %v1482_v44 = vadd.f32 %v4497_v56, %v974_v2  ;;  %v976_v51 = vpop.f32.mrb[23].mxu0  ;;  %v1513_v12 = vmax.f32 %v1481_v21, 0.0  ;;  %v4500_v56 = vld [vmem:[#allocation13_spill] sm:$0xff] }
 0x241   :  { %v3861_v39 = vadd.f32 %v976_v51, %v255_v28 }
 0x242   :  { %v1514_v31 = vmax.f32 %v1482_v44, 0.0 }
 0x244   :  { %v1540_v57 = vpack.c.bf16 %v1514_v31, %v1513_v12 }
 0x245   :  { %v980_v37 = vpop.f32.mrb[24].mxu0 }
 0x246   :  { %v1483_v3 = vadd.f32 %v3434_v58, %v980_v37  ;;  %v982_v47 = vpop.f32.mrb[25].mxu0  ;;  %2891 = vmatmul.mubr.bf16.gmra.mrb[24].mxu1 %v1540_v57  ;;  %v4501_v57 = vld [vmem:[#allocation14_spill] sm:$0xff] }
 0x247   :  { %v3864_v20 = vadd.f32 %v982_v47, %v255_v28  ;;  %v984_v23 = vpop.f32.mrb[26].mxu0  ;;  %v4502_v24 = vsub.f32 %v4501_v57, %v3346_v61  ;;  %v4509_v57 = vsub.f32 %v3578_v11, %v3346_v61 }
 0x248   :  { %v1484_v4 = vadd.f32 %v3443_v63, %v984_v23  ;;  %v986_v18 = vpop.f32.mrb[27].mxu0  ;;  %v1515_v49 = vmax.f32 %v1483_v3, 0.0  ;;  %v4503_v23 = vld [vmem:[#allocation15_spill] sm:$0xff] }
 0x249   :  { %v3867_v17 = vadd.f32 %v986_v18, %v255_v28 }
 0x24a   :  { %v1516_v41 = vmax.f32 %v1484_v4, 0.0  ;;  %v4504_v4 = vsub.f32 %v4503_v23, %v3346_v61 }
 0x24c   :  { %v1541_v55 = vpack.c.bf16 %v1516_v41, %v1515_v49 }
 0x24d   :  { %v990_v5 = vpop.f32.mrb[28].mxu0 }
 0x24e   :  { %v1485_v25 = vadd.f32 %v4498_v42, %v990_v5  ;;  %v992_v22 = vpop.f32.mrb[29].mxu0  ;;  %2894 = vmatprep.mubr.bf16.mxu1 %v1541_v55 }
 0x24f   :  { %v3872_v58 = vadd.f32 %v992_v22, %v255_v28  ;;  %v994_v16 = vpop.f32.mrb[30].mxu0  ;;  %v4505_v22 = vld [vmem:[#allocation17_spill] sm:$0xff] }
 0x250   :  { %v1486_v63 = vadd.f32 %v4499_v10, %v994_v16  ;;  %v996_v40 = vpop.f32.mrb[31].mxu0  ;;  %v1517_v48 = vmax.f32 %v1485_v25, 0.0 }
 0x251   :  { %v3877_v29 = vadd.f32 %v996_v40, %v255_v28 }
 0x252   :  { %v1518_v35 = vmax.f32 %v1486_v63, 0.0 }
 0x254   :  { %v1542_v26 = vpack.c.bf16 %v1518_v35, %v1517_v48  ;;  %v4506_v48 = vld [vmem:[#allocation18_spill] sm:$0xff] }
 0x255   :  { %v1000_v59 = vpop.f32.mrb[32].mxu0 }
 0x256   :  { %v1487_v38 = vadd.f32 %v3440_v60, %v1000_v59  ;;  %v1002_v21 = vpop.f32.mrb[33].mxu0  ;;  %2895 = vmatmul.mubr.bf16.gmra.mrb[28].mxu1 %v1542_v26 }
 0x257   :  { %v3882_v33 = vadd.f32 %v1002_v21, %v256_v19  ;;  %v1004_v2 = vpop.f32.mrb[34].mxu0 }
 0x258   :  { %v1488_v45 = vadd.f32 %v4500_v56, %v1004_v2  ;;  %v1006_v1 = vpop.f32.mrb[35].mxu0  ;;  %v1519_v28 = vmax.f32 %v1487_v38, 0.0 }
 0x259   :  { %v3885_v44 = vadd.f32 %v1006_v1, %v256_v19 }
 0x25a   :  { %v1520_v51 = vmax.f32 %v1488_v45, 0.0  ;;  %v4507_v45 = vld [vmem:[#allocation19_spill] sm:$0xff] }
 0x25b   :  { %v4508_v1 = vsub.f32 %v4507_v45, %v3346_v61 }
 0x25c   :  { %v1543_v12 = vpack.c.bf16 %v1520_v51, %v1519_v28 }
 0x25d   :  { %v1010_v31 = vpop.f32.mrb[36].mxu0 }
 0x25e   :  { %v1489_v37 = vadd.f32 %v4502_v24, %v1010_v31  ;;  %v1012_v3 = vpop.f32.mrb[37].mxu0  ;;  %2898 = vmatprep.mubr.bf16.mxu1 %v1543_v12 }
 0x25f   :  { %v3890_v60 = vadd.f32 %v1012_v3, %v256_v19  ;;  %v1014_v47 = vpop.f32.mrb[38].mxu0 }
 0x260   :  { %v1490_v18 = vadd.f32 %v4504_v4, %v1014_v47  ;;  %v1016_v49 = vpop.f32.mrb[39].mxu0  ;;  %v1521_v55 = vmax.f32 %v1489_v37, 0.0 }
 0x261   :  { %v3895_v41 = vadd.f32 %v1016_v49, %v256_v19 }
 0x262   :  { %v1522_v5 = vmax.f32 %v1490_v18, 0.0  ;;  %v4510_v18 = vld [vmem:[#allocation12_spill] sm:$0xff] }
 0x263   :  { %v257_v49 = vadd.f32 %v4510_v18, %v3809_v27  ;;  %v4514_v27 = vsub.f32 %v3684_v6, %v3360_v9 }
 0x264   :  { %v1544_v42 = vpack.c.bf16 %v1522_v5, %v1521_v55  ;;  %v4511_v5 = vld [vmem:[#allocation16_spill] sm:$0xff] }
 0x265   :  { %v1020_v25 = vpop.f32.mrb[40].mxu0 }
 0x266   :  { %v1491_v16 = vadd.f32 %v4505_v22, %v1020_v25  ;;  %v1022_v10 = vpop.f32.mrb[41].mxu0  ;;  %2899 = vmatmul.mubr.bf16.gmra.mrb[32].mxu1 %v1544_v42 }
 0x267   :  { %v3898_v63 = vadd.f32 %v1022_v10, %v256_v19  ;;  %v1024_v40 = vpop.f32.mrb[42].mxu0 }
 0x268   :  { %v1492_v35 = vadd.f32 %v4506_v48, %v1024_v40  ;;  %v1026_v26 = vpop.f32.mrb[43].mxu0  ;;  %v1523_v38 = vmax.f32 %v1491_v16, 0.0 }
 0x269   :  { %v3901_v59 = vadd.f32 %v1026_v26, %v256_v19 }
 0x26a   :  { %v1524_v21 = vmax.f32 %v1492_v35, 0.0 }
 0x26c   :  { %v1545_v2 = vpack.c.bf16 %v1524_v21, %v1523_v38 }
 0x26d   :  { %v1030_v56 = vpop.f32.mrb[44].mxu0 }
 0x26e   :  { %v1493_v28 = vadd.f32 %v4508_v1, %v1030_v56  ;;  %v1032_v51 = vpop.f32.mrb[45].mxu0  ;;  %2902 = vmatprep.mubr.bf16.mxu1 %v1545_v2  ;;  %v4515_v56 = vsub.f32 %v3705_v15, %v3360_v9 }
 0x26f   :  { %v3906_v12 = vadd.f32 %v1032_v51, %v256_v19  ;;  %v1034_v31 = vpop.f32.mrb[46].mxu0 }
 0x270   :  { %v1494_v24 = vadd.f32 %v4509_v57, %v1034_v31  ;;  %v1036_v37 = vpop.f32.mrb[47].mxu0  ;;  %v1525_v47 = vmax.f32 %v1493_v28, 0.0 }
 0x271   :  { %v3911_v3 = vadd.f32 %v1036_v37, %v256_v19 }
 0x272   :  { %v1526_v23 = vmax.f32 %v1494_v24, 0.0  ;;  %v4517_v24 = vld [vmem:[#allocation20_spill] sm:$0xff] }
 0x274   :  { %v1546_v4 = vpack.c.bf16 %v1526_v23, %v1525_v47 }
 0x275   :  { %v1040_v55 = vpop.f32.mrb[48].mxu0 }
 0x276   :  { %v1495_v42 = vadd.f32 %v4511_v5, %v1040_v55  ;;  %v1042_v25 = vpop.f32.mrb[49].mxu0  ;;  %2903 = vmatmul.mubr.bf16.gmra.mrb[36].mxu1 %v1546_v4  ;;  %v4519_v4 = vld [vmem:[#allocation21_spill] sm:$0xff] }
 0x277   :  { %v3916_v22 = vadd.f32 %v1042_v25, %v257_v49  ;;  %v1044_v16 = vpop.f32.mrb[50].mxu0 }
 0x278   :  { %v1496_v61 = vadd.f32 %v3675_v8, %v1044_v16  ;;  %v1046_v11 = vpop.f32.mrb[51].mxu0  ;;  %v1527_v19 = vmax.f32 %v1495_v42, 0.0 }
 0x279   :  { %4512 = vst [vmem:[#allocation13_spill] sm:$0xff] %v3916_v22  ;;  %v3919_v10 = vadd.f32 %v1046_v11, %v257_v49 }
 0x27a   :  { %v1528_v40 = vmax.f32 %v1496_v61, 0.0 }
 0x27b   :  { %4513 = vst [vmem:[#allocation14_spill] sm:$0xff] %v3919_v10 }
 0x27c   :  { %v1547_v48 = vpack.c.bf16 %v1528_v40, %v1527_v19 }
 0x27d   :  { %v1050_v35 = vpop.f32.mrb[52].mxu0 }
 0x27e   :  { %v1497_v26 = vadd.f32 %v4514_v27, %v1050_v35  ;;  %v1052_v38 = vpop.f32.mrb[53].mxu0  ;;  %2906 = vmatprep.mubr.bf16.mxu1 %v1547_v48 }
 0x27f   :  { %v3924_v21 = vadd.f32 %v1052_v38, %v257_v49  ;;  %v1054_v2 = vpop.f32.mrb[54].mxu0 }
 0x280   :  { %v1498_v8 = vadd.f32 %v4515_v56, %v1054_v2  ;;  %v1056_v45 = vpop.f32.mrb[55].mxu0  ;;  %v1529_v28 = vmax.f32 %v1497_v26, 0.0 }
 0x281   :  { %v3929_v1 = vadd.f32 %v1056_v45, %v257_v49 }
 0x282   :  { %v1530_v51 = vmax.f32 %v1498_v8, 0.0 }
 0x283   :  { %4516 = vst [vmem:[#allocation15_spill] sm:$0xff] %v3929_v1 }
 0x284   :  { %v1548_v31 = vpack.c.bf16 %v1530_v51, %v1529_v28 }
 0x285   :  { %v1060_v57 = vpop.f32.mrb[56].mxu0 }
 0x286   :  { %v1499_v37 = vadd.f32 %v4517_v24, %v1060_v57  ;;  %v1062_v6 = vpop.f32.mrb[57].mxu0  ;;  %2907 = vmatmul.mubr.bf16.gmra.mrb[40].mxu1 %v1548_v31 }
 0x287   :  { %v3932_v47 = vadd.f32 %v1062_v6, %v257_v49  ;;  %v1064_v23 = vpop.f32.mrb[58].mxu0 }
 0x288   :  { %v1500_v18 = vadd.f32 %v4519_v4, %v1064_v23  ;;  %v1066_v55 = vpop.f32.mrb[59].mxu0  ;;  %v1531_v15 = vmax.f32 %v1499_v37, 0.0 }
 0x289   :  { %4518 = vst [vmem:[#allocation17_spill] sm:$0xff] %v3932_v47  ;;  %v3935_v5 = vadd.f32 %v1066_v55, %v257_v49 }
 0x28a   :  { %v1532_v42 = vmax.f32 %v1500_v18, 0.0 }
 0x28b   :  { %4520 = vst [vmem:[#allocation18_spill] sm:$0xff] %v3935_v5 }
 0x28c   :  { %v1549_v25 = vpack.c.bf16 %v1532_v42, %v1531_v15 }
 0x28d   :  { %v1070_v16 = vpop.f32.mrb[60].mxu0 }
 0x28e   :  { %v1501_v61 = vadd.f32 %v1469_v14, %v1070_v16  ;;  %v1072_v11 = vpop.f32.mrb[61].mxu0  ;;  %2910 = vmatprep.mubr.bf16.mxu1 %v1549_v25 }
 0x28f   :  { %v3940_v19 = vadd.f32 %v1072_v11, %v257_v49  ;;  %v1074_v40 = vpop.f32.mrb[62].mxu0 }
 0x290   :  { %v1502_v48 = vadd.f32 %v1470_v52, %v1074_v40  ;;  %v1076_v35 = vpop.f32.mrb[63].mxu0  ;;  %v1533_v26 = vmax.f32 %v1501_v61, 0.0 }
 0x291   :  { %4521 = vst [vmem:[#allocation19_spill] sm:$0xff] %v3940_v19  ;;  %v3945_v27 = vadd.f32 %v1076_v35, %v257_v49 }
 0x292   :  { %v1534_v38 = vmax.f32 %v1502_v48, 0.0 }
 0x293   :  { %4522 = vst [vmem:[#allocation12_spill] sm:$0xff] %v3945_v27 }
 0x294   :  { %v1550_v2 = vpack.c.bf16 %v1534_v38, %v1533_v26 }
 0x296   :  { %2911 = vmatmul.mubr.bf16.gmra.mrb[44].mxu1 %v1550_v2 }
 0x2f9   :  { %v2884_v56 = vpop.f32.mrb[16].mxu1 }
 0x2fa   :  { %v1822_v36 = vsel %vm127_vm0, %v2884_v56, -inf  ;;  %v1649_v14 = vpop.f32.mrb[17].mxu1 }
 0x2fb   :  { %v1823_v8 = vrot.slane %v1822_v36, 4  ;;  %v1808_v45 = vsel %vm127_vm0, %v1649_v14, -inf  ;;  %v2885_v28 = vpop.f32.mrb[18].mxu1 }
 0x2fc   :  { %v1809_v51 = vrot.slane %v1808_v45, 4  ;;  %v1829_v31 = vsel %vm127_vm0, %v2885_v28, -inf  ;;  %v1652_v9 = vpop.f32.mrb[19].mxu1 }
 0x2fd   :  { %v1824_v50 = vmax.f32 %v1822_v36, %v1823_v8  ;;  %v1830_v52 = vrot.slane %v1829_v31, 4  ;;  %v1815_v49 = vsel %vm127_vm0, %v1652_v9, -inf }
 0x2fe   :  { %v1810_v57 = vmax.f32 %v1808_v45, %v1809_v51  ;;  %v1816_v24 = vrot.slane %v1815_v49, 4 }
 0x2ff   :  { %v1825_v37 = vrot.slane %v1824_v50, 2  ;;  %v1831_v6 = vmax.f32 %v1829_v31, %v1830_v52 }
 0x300   :  { %v1811_v23 = vrot.slane %v1810_v57, 2  ;;  %v1817_v4 = vmax.f32 %v1815_v49, %v1816_v24 }
 0x301   :  { %v1826_v18 = vmax.f32 %v1824_v50, %v1825_v37  ;;  %v1832_v55 = vrot.slane %v1831_v6, 2 }
 0x302   :  { %v1812_v15 = vmax.f32 %v1810_v57, %v1811_v23  ;;  %v1818_v42 = vrot.slane %v1817_v4, 2 }
 0x303   :  { %v1827_v25 = vrot.slane %v1826_v18, 1  ;;  %v1833_v16 = vmax.f32 %v1831_v6, %v1832_v55 }
 0x304   :  { %v1813_v61 = vrot.slane %v1812_v15, 1  ;;  %v1819_v11 = vmax.f32 %v1817_v4, %v1818_v42 }
 0x305   :  { %v1828_v40 = vmax.f32 %v1826_v18, %v1827_v25  ;;  %v1834_v48 = vrot.slane %v1833_v16, 1 }
 0x306   :  { %v1814_v35 = vmax.f32 %v1812_v15, %v1813_v61  ;;  %v1820_v26 = vrot.slane %v1819_v11, 1 }
 0x307   :  { %v2034_v38 = vsub.f32 %v2884_v56, %v1828_v40  ;;  %v1835_v2 = vmax.f32 %v1833_v16, %v1834_v48 }
 0x308   :  { %v2032_v36 = vsub.f32 %v1649_v14, %v1814_v35  ;;  %v1821_v8 = vmax.f32 %v1819_v11, %v1820_v26 }
 0x309   :  { %v2068_v45 = vmul.f32 1.442695, %v2034_v38  ;;  %v2035_v51 = vsub.f32 %v2885_v28, %v1835_v2  ;;  %v3951_v31 = vpop.f32.mrb[20].mxu1 }
 0x30a   :  { %v2064_v50 = vmul.f32 1.442695, %v2032_v36  ;;  %v2033_v52 = vsub.f32 %v1652_v9, %v1821_v8  ;;  %v1850_v49 = vsel %vm127_vm0, %v3951_v31, -inf  ;;  %v3955_v57 = vpop.f32.mrb[21].mxu1 }
 0x30b   :  { %2956 = vpow2.f32 %v2068_v45  ;;  %v2070_v24 = vmul.f32 1.442695, %v2035_v51  ;;  %v1851_v37 = vrot.slane %v1850_v49, 4  ;;  %v1836_v56 = vsel %vm127_vm0, %v3955_v57, -inf  ;;  %v3959_v6 = vpop.f32.mrb[22].mxu1 }
 0x30c   :  { %2958 = vpow2.f32 %v2064_v50  ;;  %v2066_v14 = vmul.f32 1.442695, %v2033_v52  ;;  %v1837_v28 = vrot.slane %v1836_v56, 4  ;;  %v1857_v23 = vsel %vm127_vm0, %v3959_v6, -inf  ;;  %v3963_v9 = vpop.f32.mrb[23].mxu1 }
 0x30d   :  { %2960 = vpow2.f32 %v2070_v24  ;;  %v1852_v4 = vmax.f32 %v1850_v49, %v1851_v37  ;;  %v1858_v18 = vrot.slane %v1857_v23, 4  ;;  %v1843_v55 = vsel %vm127_vm0, %v3963_v9, -inf }
 0x30e   :  { %2962 = vpow2.f32 %v2066_v14  ;;  %v1838_v15 = vmax.f32 %v1836_v56, %v1837_v28  ;;  %v1844_v42 = vrot.slane %v1843_v55, 4 }
 0x30f   :  { %v1853_v25 = vrot.slane %v1852_v4, 2  ;;  %v1859_v16 = vmax.f32 %v1857_v23, %v1858_v18 }
 0x310   :  { %v1839_v61 = vrot.slane %v1838_v15, 2  ;;  %v1845_v11 = vmax.f32 %v1843_v55, %v1844_v42 }
 0x311   :  { %v1854_v40 = vmax.f32 %v1852_v4, %v1853_v25  ;;  %v1860_v48 = vrot.slane %v1859_v16, 2 }
 0x312   :  { %v1840_v35 = vmax.f32 %v1838_v15, %v1839_v61  ;;  %v1846_v26 = vrot.slane %v1845_v11, 2 }
 0x313   :  { %v1855_v38 = vrot.slane %v1854_v40, 1  ;;  %v3967_v2 = vmax.f32 %v1859_v16, %v1860_v48 }
 0x314   :  { %v1841_v36 = vrot.slane %v1840_v35, 1  ;;  %v3969_v8 = vmax.f32 %v1845_v11, %v1846_v26 }
 0x315   :  { %v2957_v45 = vpop.eup %2956  ;;  %v3971_v51 = vmax.f32 %v1854_v40, %v1855_v38 }
 0x316   :  { %v2959_v52 = vpop.eup %2958  ;;  %v2142_v49 = vsel %vm127_vm0, %v2957_v45, 0.0  ;;  %v2354_v24 = vmul.f32 %v2957_v45, %v3822_v62  ;;  %v3976_v37 = vmax.f32 %v1840_v35, %v1841_v36 }
 0x317   :  { %v2961_v14 = vpop.eup %2960  ;;  %v2143_v28 = vrot.slane %v2142_v49, 4  ;;  %v2128_v23 = vsel %vm127_vm0, %v2959_v52, 0.0  ;;  %v2352_v4 = vmul.f32 %v2959_v52, %v3814_v43  ;;  %v2038_v18 = vsub.f32 %v3951_v31, %v3971_v51 }
 0x318   :  { %v2963_v55 = vpop.eup %2962  ;;  %v2398_v15 = vsel %vm127_vm0, %v2354_v24, 0.0  ;;  %v2129_v42 = vrot.slane %v2128_v23, 4  ;;  %v2149_v25 = vsel %vm127_vm0, %v2961_v14, 0.0  ;;  %v2355_v62 = vmul.f32 %v2961_v14, %v3827_v34 }
 0x319   :  { %v2144_v16 = vadd.f32 %v2143_v28, %v2142_v49  ;;  %v2399_v61 = vrot.slane %v2398_v15, 4  ;;  %v2384_v11 = vsel %vm127_vm0, %v2352_v4, 0.0  ;;  %v2150_v40 = vrot.slane %v2149_v25, 4  ;;  %v3987_v48 = vpop.f32.mrb[24].mxu1 }
 0x31a   :  { %v2130_v35 = vadd.f32 %v2129_v42, %v2128_v23  ;;  %v2385_v43 = vrot.slane %v2384_v11, 4  ;;  %v2405_v26 = vsel %vm127_vm0, %v2355_v62, 0.0  ;;  %v2135_v31 = vsel %vm127_vm0, %v2963_v55, 0.0  ;;  %v3991_v38 = vpop.f32.mrb[25].mxu1 }
 0x31b   :  { %v2145_v36 = vrot.slane %v2144_v16, 2  ;;  %v2400_v45 = vadd.f32 %v2399_v61, %v2398_v15  ;;  %v2151_v51 = vadd.f32 %v2150_v40, %v2149_v25  ;;  %v2406_v52 = vrot.slane %v2405_v26, 4  ;;  %v3993_v34 = vpop.f32.mrb[26].mxu1 }
 0x31c   :  { %v2131_v49 = vrot.slane %v2130_v35, 2  ;;  %v2386_v24 = vadd.f32 %v2385_v43, %v2384_v11  ;;  %v2136_v14 = vrot.slane %v2135_v31, 4  ;;  %v2353_v28 = vmul.f32 %v2963_v55, %v3817_v54  ;;  %v3996_v4 = vpop.f32.mrb[27].mxu1 }
 0x31d   :  { %v2146_v23 = vadd.f32 %v2145_v36, %v2144_v16  ;;  %v2401_v42 = vrot.slane %v2400_v45, 2  ;;  %v2152_v62 = vrot.slane %v2151_v51, 2  ;;  %v2407_v56 = vadd.f32 %v2406_v52, %v2405_v26 }
 0x31e   :  { %v2132_v50 = vadd.f32 %v2131_v49, %v2130_v35  ;;  %v2387_v5 = vrot.slane %v2386_v24, 2  ;;  %v2137_v27 = vadd.f32 %v2136_v14, %v2135_v31  ;;  %v2391_v15 = vsel %vm127_vm0, %v2353_v28, 0.0 }
 0x31f   :  { %v2147_v25 = vrot.slane %v2146_v23, 1  ;;  %v2402_v61 = vadd.f32 %v2401_v42, %v2400_v45  ;;  %v2153_v40 = vadd.f32 %v2152_v62, %v2151_v51  ;;  %v2408_v47 = vrot.slane %v2407_v56, 2 }
 0x320   :  { %v2133_v19 = vrot.slane %v2132_v50, 1  ;;  %v2388_v11 = vadd.f32 %v2387_v5, %v2386_v24  ;;  %v2138_v43 = vrot.slane %v2137_v27, 2  ;;  %v2392_v10 = vrot.slane %v2391_v15, 4 }
 0x321   :  { %v2148_v54 = vadd.f32 %v2147_v25, %v2146_v23  ;;  %v2403_v55 = vrot.slane %v2402_v61, 1  ;;  %v2154_v1 = vrot.slane %v2153_v40, 1  ;;  %v2409_v16 = vadd.f32 %v2408_v47, %v2407_v56 }
 0x322   :  { %v2134_v36 = vadd.f32 %v2133_v19, %v2132_v50  ;;  %v2389_v22 = vrot.slane %v2388_v11, 1  ;;  %v2139_v26 = vadd.f32 %v2138_v43, %v2137_v27  ;;  %v2393_v35 = vadd.f32 %v2392_v10, %v2391_v15 }
 0x323   :  { %v2404_v52 = vadd.f32 %v2403_v55, %v2402_v61  ;;  %2964 = vrcp.f32 %v2148_v54  ;;  %v2155_v31 = vadd.f32 %v2154_v1, %v2153_v40  ;;  %v2410_v49 = vrot.slane %v2409_v16, 1 }
 0x324   :  { %2966 = vrcp.f32 %v2134_v36  ;;  %v2140_v45 = vrot.slane %v2139_v26, 1  ;;  %v2394_v51 = vrot.slane %v2393_v35, 2  ;;  %v2390_v14 = vadd.f32 %v2389_v22, %v2388_v11 }
 0x325   :  { %2968 = vrcp.f32 %v2155_v31  ;;  %v2076_v5 = vmul.f32 1.442695, %v2038_v18  ;;  %v2036_v24 = vsub.f32 %v3955_v57, %v3976_v37  ;;  %v4523_v47 = vrot.slane %v3967_v2, 1 }
 0x326   :  { %v2141_v28 = vadd.f32 %v2140_v45, %v2139_v26  ;;  %v2395_v23 = vadd.f32 %v2394_v51, %v2393_v35  ;;  %v4524_v10 = vrot.slane %v3969_v8, 1  ;;  %v1878_v22 = vsel %vm127_vm0, %v3987_v48, -inf }
 0x327   :  { %v1863_v19 = vmax.f32 %v3967_v2, %v4523_v47  ;;  %2970 = vpow2.f32 %v2076_v5  ;;  %v2072_v27 = vmul.f32 1.442695, %v2036_v24  ;;  %v1864_v50 = vsel %vm127_vm0, %v3991_v38, -inf }
 0x328   :  { %v1849_v1 = vmax.f32 %v3969_v8, %v4524_v10  ;;  %v2396_v56 = vrot.slane %v2395_v23, 1  ;;  %2972 = vrcp.f32 %v2141_v28  ;;  %v1879_v2 = vrot.slane %v1878_v22, 4 }
 0x329   :  { %v2039_v57 = vsub.f32 %v3959_v6, %v1863_v19  ;;  %2974 = vpow2.f32 %v2072_v27  ;;  %v1865_v18 = vrot.slane %v1864_v50, 4  ;;  %v1885_v8 = vsel %vm127_vm0, %v3993_v34, -inf  ;;  %v4015_v42 = vpop.f32.mrb[28].mxu1 }
 0x32a   :  { %v2037_v37 = vsub.f32 %v3963_v9, %v1849_v1  ;;  %v2411_v62 = vadd.f32 %v2410_v49, %v2409_v16  ;;  %v1886_v61 = vrot.slane %v1885_v8, 4  ;;  %v4017_v40 = vpop.f32.mrb[29].mxu1  ;;  %v1880_v11 = vmax.f32 %v1878_v22, %v1879_v2 }
 0x32b   :  { %v2078_v15 = vmul.f32 1.442695, %v2039_v57  ;;  %v1866_v43 = vmax.f32 %v1864_v50, %v1865_v18  ;;  %v1871_v6 = vsel %vm127_vm0, %v3996_v4, -inf  ;;  %v1906_v9 = vsel %vm127_vm0, %v4015_v42, -inf  ;;  %v4023_v54 = vpop.f32.mrb[30].mxu1 }
 0x32c   :  { %v2074_v25 = vmul.f32 1.442695, %v2037_v37  ;;  %v1887_v55 = vmax.f32 %v1885_v8, %v1886_v61  ;;  %v1872_v36 = vrot.slane %v1871_v6, 4  ;;  %v1907_v26 = vrot.slane %v1906_v9, 4  ;;  %v4025_v16 = vpop.f32.mrb[31].mxu1 }
 0x32d   :  { %2976 = vpow2.f32 %v2078_v15  ;;  %v2965_v35 = vpop.eup %2964  ;;  %v1881_v31 = vrot.slane %v1880_v11, 2  ;;  %v1867_v49 = vrot.slane %v1866_v43, 2  ;;  %v1892_v45 = vsel %vm127_vm0, %v4017_v40, -inf }
 0x32e   :  { %2978 = vpow2.f32 %v2074_v25  ;;  %v2967_v51 = vpop.eup %2966  ;;  %v4029_v5 = vmul.f32 %v2965_v35, %v2404_v52  ;;  %v1888_v24 = vrot.slane %v1887_v55, 2  ;;  %v1873_v28 = vmax.f32 %v1871_v6, %v1872_v36 }
 0x32f   :  { %v4031_v47 = vmax.f32 %v1906_v9, %v1907_v26  ;;  %v2969_v19 = vpop.eup %2968  ;;  %v4033_v10 = vmul.f32 %v2967_v51, %v2390_v14  ;;  %v1882_v1 = vmax.f32 %v1880_v11, %v1881_v31  ;;  %v1868_v27 = vmax.f32 %v1866_v43, %v1867_v49 }
 0x330   :  { %4525 = vst [vmem:[#allocation16_spill] sm:$0xff] %v4029_v5  ;;  %v1893_v22 = vrot.slane %v1892_v45, 4  ;;  %v4035_v50 = vmul.f32 %v2969_v19, %v2411_v62  ;;  %v2397_v57 = vadd.f32 %v2396_v56, %v2395_v23  ;;  %v1889_v37 = vmax.f32 %v1887_v55, %v1888_v24 }
 0x331   :  { %4526 = vst [vmem:[#allocation20_spill] sm:$0xff] %v4033_v10  ;;  %v1874_v2 = vrot.slane %v1873_v28, 2  ;;  %v2971_v18 = vpop.eup %2970  ;;  %v1883_v8 = vrot.slane %v1882_v1, 1  ;;  %v1869_v15 = vrot.slane %v1868_v27, 1  ;;  %v4044_v62 = vsel %vm127_vm0, %v4023_v54, -inf }
 0x332   :  { %4527 = vst [vmem:[#allocation21_spill] sm:$0xff] %v4035_v50  ;;  %v4038_v25 = vmax.f32 %v1892_v45, %v1893_v22  ;;  %v2973_v61 = vpop.eup %2972  ;;  %v2170_v6 = vsel %vm127_vm0, %v2971_v18, 0.0  ;;  %v2358_v14 = vmul.f32 %v2971_v18, %v3838_v13  ;;  %v1890_v11 = vrot.slane %v1889_v37, 1 }
 0x333   :  { %v2975_v23 = vpop.eup %2974  ;;  %v4046_v56 = vmul.f32 %v2973_v61, %v2397_v57  ;;  %v2171_v43 = vrot.slane %v2170_v6, 4  ;;  %v1884_v9 = vmax.f32 %v1882_v1, %v1883_v8  ;;  %v1870_v55 = vmax.f32 %v1868_v27, %v1869_v15 }
 0x334   :  { %v2426_v36 = vsel %vm127_vm0, %v2358_v14, 0.0  ;;  %v2156_v26 = vsel %vm127_vm0, %v2975_v23, 0.0  ;;  %v2356_v35 = vmul.f32 %v2975_v23, %v3830_v46  ;;  %v1891_v31 = vmax.f32 %v1889_v37, %v1890_v11 }
 0x335   :  { %4528 = vst [vmem:[#allocation22_spill] sm:$0xff] %v4046_v56  ;;  %v2172_v49 = vadd.f32 %v2171_v43, %v2170_v6  ;;  %v2427_v13 = vrot.slane %v2426_v36, 4  ;;  %v2157_v45 = vrot.slane %v2156_v26, 4  ;;  %v1875_v51 = vmax.f32 %v1873_v28, %v1874_v2 }
 0x336   :  { %v2412_v19 = vsel %vm127_vm0, %v2356_v35, 0.0  ;;  %v2042_v22 = vsub.f32 %v3987_v48, %v1884_v9  ;;  %v2040_v57 = vsub.f32 %v3991_v38, %v1870_v55  ;;  %v2043_v1 = vsub.f32 %v3993_v34, %v1891_v31 }
 0x337   :  { %v2977_v24 = vpop.eup %2976  ;;  %v2173_v18 = vrot.slane %v2172_v49, 2  ;;  %v2428_v8 = vadd.f32 %v2427_v13, %v2426_v36  ;;  %v2158_v15 = vadd.f32 %v2157_v45, %v2156_v26  ;;  %v2413_v61 = vrot.slane %v2412_v19, 4 }
 0x338   :  { %v2979_v27 = vpop.eup %2978  ;;  %v2177_v46 = vsel %vm127_vm0, %v2977_v24, 0.0  ;;  %v2359_v37 = vmul.f32 %v2977_v24, %v3843_v53 }
 0x339   :  { %v2163_v28 = vsel %vm127_vm0, %v2979_v27, 0.0  ;;  %v2357_v2 = vmul.f32 %v2979_v27, %v3833_v32  ;;  %v2174_v6 = vadd.f32 %v2173_v18, %v2172_v49  ;;  %v2429_v14 = vrot.slane %v2428_v8, 2  ;;  %v4059_v38 = vpop.f32.mrb[32].mxu1 }
 0x33a   :  { %v2159_v48 = vrot.slane %v2158_v15, 2  ;;  %v2414_v11 = vadd.f32 %v2413_v61, %v2412_v19  ;;  %v2178_v34 = vrot.slane %v2177_v46, 4  ;;  %v2433_v23 = vsel %vm127_vm0, %v2359_v37, 0.0  ;;  %v4063_v55 = vpop.f32.mrb[33].mxu1 }
 0x33b   :  { %v2164_v43 = vrot.slane %v2163_v28, 4  ;;  %v2419_v9 = vsel %vm127_vm0, %v2357_v2, 0.0  ;;  %v2175_v36 = vrot.slane %v2174_v6, 1  ;;  %v4065_v53 = vadd.f32 %v2429_v14, %v2428_v8  ;;  %v4067_v32 = vpop.f32.mrb[34].mxu1 }
 0x33c   :  { %v2160_v26 = vadd.f32 %v2159_v48, %v2158_v15  ;;  %v2415_v35 = vrot.slane %v2414_v11, 2  ;;  %v2179_v31 = vadd.f32 %v2178_v34, %v2177_v46  ;;  %v2434_v49 = vrot.slane %v2433_v23, 4  ;;  %v4069_v24 = vpop.f32.mrb[35].mxu1 }
 0x33d   :  { %v2165_v13 = vadd.f32 %v2164_v43, %v2163_v28  ;;  %v2420_v45 = vrot.slane %v2419_v9, 4  ;;  %v2176_v19 = vadd.f32 %v2175_v36, %v2174_v6  ;;  %v1876_v61 = vrot.slane %v1875_v51, 1 }
 0x33e   :  { %v2161_v27 = vrot.slane %v2160_v26, 1  ;;  %v2416_v18 = vadd.f32 %v2415_v35, %v2414_v11  ;;  %v2180_v37 = vrot.slane %v2179_v31, 2  ;;  %v2435_v2 = vadd.f32 %v2434_v49, %v2433_v23 }
 0x33f   :  { %v2166_v52 = vrot.slane %v2165_v13, 2  ;;  %v2421_v50 = vadd.f32 %v2420_v45, %v2419_v9  ;;  %v2084_v48 = vmul.f32 1.442695, %v2042_v22  ;;  %2980 = vrcp.f32 %v2176_v19 }
 0x340   :  { %v2162_v15 = vadd.f32 %v2161_v27, %v2160_v26  ;;  %v2417_v14 = vrot.slane %v2416_v18, 1  ;;  %v2181_v5 = vadd.f32 %v2180_v37, %v2179_v31  ;;  %v2436_v46 = vrot.slane %v2435_v2, 2 }
 0x341   :  { %v2167_v34 = vadd.f32 %v2166_v52, %v2165_v13  ;;  %v2422_v28 = vrot.slane %v2421_v50, 2  ;;  %v2080_v6 = vmul.f32 1.442695, %v2040_v57  ;;  %v2086_v36 = vmul.f32 1.442695, %v2043_v1 }
 0x342   :  { %v4072_v43 = vadd.f32 %v2417_v14, %v2416_v18  ;;  %2982 = vrcp.f32 %v2162_v15  ;;  %v2182_v11 = vrot.slane %v2181_v5, 1  ;;  %v1877_v9 = vmax.f32 %v1875_v51, %v1876_v61 }
 0x343   :  { %v2168_v35 = vrot.slane %v2167_v34, 1  ;;  %v2423_v23 = vadd.f32 %v2422_v28, %v2421_v50  ;;  %2984 = vpow2.f32 %v2084_v48  ;;  %v4530_v49 = vrot.slane %v4031_v47, 2 }
 0x344   :  { %4529 = vst [vmem:[#allocation23_spill] sm:$0xff] %v4072_v43  ;;  %v1895_v22 = vrot.slane %v4038_v25, 2  ;;  %v2183_v31 = vadd.f32 %v2182_v11, %v2181_v5  ;;  %v4078_v52 = vadd.f32 %v2436_v46, %v2435_v2  ;;  %2986 = vpow2.f32 %v2080_v6 }
 0x345   :  { %v1910_v26 = vmax.f32 %v4031_v47, %v4530_v49  ;;  %v2424_v13 = vrot.slane %v2423_v23, 1  ;;  %2988 = vpow2.f32 %v2086_v36  ;;  %v2041_v57 = vsub.f32 %v3996_v4, %v1877_v9 }
 0x346   :  { %v1896_v45 = vmax.f32 %v4038_v25, %v1895_v22  ;;  %2990 = vrcp.f32 %v2183_v31  ;;  %v2169_v50 = vadd.f32 %v2168_v35, %v2167_v34  ;;  %v1914_v51 = vrot.slane %v4044_v62, 4 }
 0x347   :  { %v1911_v1 = vrot.slane %v1910_v26, 1  ;;  %v1899_v47 = vsel %vm127_vm0, %v4025_v16, -inf  ;;  %v4085_v19 = vadd.f32 %v2424_v13, %v2423_v23  ;;  %v2082_v5 = vmul.f32 1.442695, %v2041_v57 }
 0x348   :  { %v1897_v18 = vrot.slane %v1896_v45, 1  ;;  %v1915_v61 = vmax.f32 %v4044_v62, %v1914_v51  ;;  %v1900_v37 = vrot.slane %v1899_v47, 4  ;;  %v1934_v4 = vsel %vm127_vm0, %v4059_v38, -inf }
 0x349   :  { %4531 = vst [vmem:[#allocation24_spill] sm:$0xff] %v4085_v19  ;;  %v1912_v27 = vmax.f32 %v1910_v26, %v1911_v1  ;;  %v1920_v25 = vsel %vm127_vm0, %v4063_v55, -inf  ;;  %2992 = vpow2.f32 %v2082_v5  ;;  %v1935_v14 = vrot.slane %v1934_v4, 4  ;;  %v4093_v48 = vpop.f32.mrb[36].mxu1  ;;  %v4099_v36 = vpop.eup %2980 }
 0x34a   :  { %v1898_v15 = vmax.f32 %v1896_v45, %v1897_v18  ;;  %v1916_v46 = vrot.slane %v1915_v61, 2  ;;  %v1901_v34 = vmax.f32 %v1899_v47, %v1900_v37  ;;  %v1921_v28 = vrot.slane %v1920_v25, 4  ;;  %v4097_v6 = vpop.f32.mrb[37].mxu1  ;;  %4532 = vst [vmem:[#allocation25_spill] sm:$0xff] %v4099_v36 }
 0x34b   :  { %v2046_v2 = vsub.f32 %v4015_v42, %v1912_v27  ;;  %v1941_v62 = vsel %vm127_vm0, %v4067_v32, -inf  ;;  %v4102_v23 = vmax.f32 %v1934_v4, %v1935_v14  ;;  %v4104_v9 = vpop.f32.mrb[38].mxu1  ;;  %2994 = vrcp.f32 %v2169_v50 }
 0x34c   :  { %v2044_v35 = vsub.f32 %v4017_v40, %v1898_v15  ;;  %v1942_v42 = vrot.slane %v1941_v62, 4  ;;  %v4106_v49 = vpop.eup %2982  ;;  %v4108_v26 = vmax.f32 %v1915_v61, %v1916_v46  ;;  %v1902_v22 = vrot.slane %v1901_v34, 2  ;;  %v4112_v13 = vpop.f32.mrb[39].mxu1 }
 0x34d   :  { %v2092_v11 = vmul.f32 1.442695, %v2046_v2  ;;  %4533 = vst [vmem:[#allocation26_spill] sm:$0xff] %v4106_v49  ;;  %v4110_v31 = vmax.f32 %v1920_v25, %v1921_v28  ;;  %v2985_v57 = vpop.eup %2984  ;;  %v4117_v45 = vsel %vm127_vm0, %v4069_v24, -inf }
 0x34e   :  { %v2088_v1 = vmul.f32 1.442695, %v2044_v35  ;;  %v2987_v51 = vpop.eup %2986  ;;  %v2198_v47 = vsel %vm127_vm0, %v2985_v57, 0.0  ;;  %v2362_v50 = vmul.f32 %v2985_v57, %v3856_v30  ;;  %v1918_v5 = vrot.slane %v4108_v26, 1 }
 0x34f   :  { %2996 = vpow2.f32 %v2092_v11  ;;  %v4122_v27 = vmax.f32 %v1941_v62, %v1942_v42  ;;  %v2989_v18 = vpop.eup %2988  ;;  %v2199_v61 = vrot.slane %v2198_v47, 4  ;;  %v2184_v37 = vsel %vm127_vm0, %v2987_v51, 0.0 }
 0x350   :  { %v2360_v4 = vmul.f32 %v2987_v51, %v3848_v7  ;;  %2998 = vpow2.f32 %v2088_v1  ;;  %v4126_v25 = vpop.eup %2990  ;;  %v2454_v2 = vsel %vm127_vm0, %v2362_v50, 0.0  ;;  %v2185_v15 = vrot.slane %v2184_v37, 4 }
 0x351   :  { %4534 = vst [vmem:[#allocation27_spill] sm:$0xff] %v4126_v25  ;;  %v2205_v14 = vsel %vm127_vm0, %v2989_v18, 0.0  ;;  %v2363_v30 = vmul.f32 %v2989_v18, %v3861_v39  ;;  %v2200_v46 = vadd.f32 %v2199_v61, %v2198_v47  ;;  %v2455_v28 = vrot.slane %v2454_v2, 4 }
 0x352   :  { %v2440_v62 = vsel %vm127_vm0, %v2360_v4, 0.0  ;;  %v2206_v11 = vrot.slane %v2205_v14, 4  ;;  %v2186_v35 = vadd.f32 %v2185_v15, %v2184_v37  ;;  %v4133_v7 = vmax.f32 %v1901_v34, %v1902_v22 }
 0x353   :  { %v2441_v42 = vrot.slane %v2440_v62, 4  ;;  %v2461_v57 = vsel %vm127_vm0, %v2363_v30, 0.0  ;;  %v2993_v1 = vpop.eup %2992  ;;  %v2201_v51 = vrot.slane %v2200_v46, 2  ;;  %v2456_v8 = vadd.f32 %v2455_v28, %v2454_v2 }
 0x354   :  { %v2207_v50 = vadd.f32 %v2206_v11, %v2205_v14  ;;  %v2462_v40 = vrot.slane %v2461_v57, 4  ;;  %v2187_v56 = vrot.slane %v2186_v35, 2  ;;  %v2191_v39 = vsel %vm127_vm0, %v2993_v1, 0.0 }
 0x355   :  { %v2442_v10 = vadd.f32 %v2441_v42, %v2440_v62  ;;  %v2361_v47 = vmul.f32 %v2993_v1, %v3851_v0  ;;  %v2202_v18 = vadd.f32 %v2201_v51, %v2200_v46  ;;  %v2457_v61 = vrot.slane %v2456_v8, 2  ;;  %v4137_v15 = vpop.eup %2994 }
 0x356   :  { %v2208_v4 = vrot.slane %v2207_v50, 2  ;;  %v2463_v37 = vadd.f32 %v2462_v40, %v2461_v57  ;;  %4535 = vst [vmem:[#allocation28_spill] sm:$0xff] %v4137_v15  ;;  %v2188_v30 = vadd.f32 %v2187_v56, %v2186_v35  ;;  %v2192_v22 = vrot.slane %v2191_v39, 4 }
 0x357   :  { %v2443_v34 = vrot.slane %v2442_v10, 2  ;;  %v2447_v25 = vsel %vm127_vm0, %v2361_v47, 0.0  ;;  %v2203_v14 = vrot.slane %v2202_v18, 1  ;;  %v2458_v28 = vadd.f32 %v2457_v61, %v2456_v8 }
 0x358   :  { %v2209_v11 = vadd.f32 %v2208_v4, %v2207_v50  ;;  %v2464_v62 = vrot.slane %v2463_v37, 2  ;;  %v2189_v42 = vrot.slane %v2188_v30, 1  ;;  %v2193_v19 = vadd.f32 %v2192_v22, %v2191_v39 }
 0x359   :  { %v2997_v2 = vpop.eup %2996  ;;  %v2444_v36 = vadd.f32 %v2443_v34, %v2442_v10  ;;  %v2448_v0 = vrot.slane %v2447_v25, 4  ;;  %v2204_v1 = vadd.f32 %v2203_v14, %v2202_v18  ;;  %v2459_v51 = vrot.slane %v2458_v28, 1  ;;  %v4140_v15 = vpop.f32.mrb[40].mxu1 }
 0x35a   :  { %v2999_v46 = vpop.eup %2998  ;;  %v2210_v40 = vrot.slane %v2209_v11, 1  ;;  %v2465_v57 = vadd.f32 %v2464_v62, %v2463_v37  ;;  %v2190_v56 = vadd.f32 %v2189_v42, %v2188_v30  ;;  %v2194_v49 = vrot.slane %v2193_v19, 2  ;;  %v4142_v43 = vpop.f32.mrb[41].mxu1 }
 0x35b   :  { %v2445_v35 = vrot.slane %v2444_v36, 1  ;;  %v2449_v47 = vadd.f32 %v2448_v0, %v2447_v25  ;;  %v2460_v8 = vadd.f32 %v2459_v51, %v2458_v28  ;;  %3000 = vrcp.f32 %v2204_v1  ;;  %v4145_v39 = vpop.f32.mrb[42].mxu1 }
 0x35c   :  { %v2211_v50 = vadd.f32 %v2210_v40, %v2209_v11  ;;  %v1919_v10 = vmax.f32 %v4108_v26, %v1918_v5  ;;  %3002 = vrcp.f32 %v2190_v56  ;;  %v2466_v18 = vrot.slane %v2465_v57, 1  ;;  %v4147_v37 = vpop.f32.mrb[43].mxu1 }
 0x35d   :  { %v2195_v61 = vadd.f32 %v2194_v49, %v2193_v19  ;;  %v2450_v4 = vrot.slane %v2449_v47, 2  ;;  %v2446_v34 = vadd.f32 %v2445_v35, %v2444_v36  ;;  %v2226_v30 = vsel %vm127_vm0, %v2997_v2, 0.0 }
 0x35e   :  { %3004 = vrcp.f32 %v2211_v50  ;;  %v2366_v25 = vmul.f32 %v2997_v2, %v3872_v58  ;;  %v2227_v28 = vrot.slane %v2226_v30, 4  ;;  %v2212_v11 = vsel %vm127_vm0, %v2999_v46, 0.0 }
 0x35f   :  { %v2196_v22 = vrot.slane %v2195_v61, 1  ;;  %v2451_v14 = vadd.f32 %v2450_v4, %v2449_v47  ;;  %v2213_v5 = vrot.slane %v2212_v11, 4  ;;  %v2364_v62 = vmul.f32 %v2999_v46, %v3864_v20 }
 0x360   :  { %v2482_v26 = vsel %vm127_vm0, %v2366_v25, 0.0  ;;  %v2047_v19 = vsub.f32 %v4023_v54, %v1919_v10  ;;  %v2467_v49 = vadd.f32 %v2466_v18, %v2465_v57  ;;  %v2228_v36 = vadd.f32 %v2227_v28, %v2226_v30 }
 0x361   :  { %v2197_v42 = vadd.f32 %v2196_v22, %v2195_v61  ;;  %v2483_v0 = vrot.slane %v2482_v26, 4  ;;  %v2214_v1 = vadd.f32 %v2213_v5, %v2212_v11  ;;  %v2468_v51 = vsel %vm127_vm0, %v2364_v62, 0.0 }
 0x362   :  { %v2094_v58 = vmul.f32 1.442695, %v2047_v19  ;;  %v1904_v2 = vrot.slane %v4133_v7, 1  ;;  %v2452_v40 = vrot.slane %v2451_v14, 1  ;;  %v2229_v56 = vrot.slane %v2228_v36, 2 }
 0x363   :  { %3006 = vrcp.f32 %v2197_v42  ;;  %v2484_v35 = vadd.f32 %v2483_v0, %v2482_v26  ;;  %v2215_v47 = vrot.slane %v2214_v1, 2  ;;  %v2469_v50 = vrot.slane %v2468_v51, 4 }
 0x364   :  { %3008 = vpow2.f32 %v2094_v58  ;;  %v1905_v20 = vmax.f32 %v4133_v7, %v1904_v2  ;;  %v2230_v54 = vadd.f32 %v2229_v56, %v2228_v36  ;;  %v4536_v57 = vrot.slane %v4102_v23, 2 }
 0x365   :  { %v2485_v46 = vrot.slane %v2484_v35, 2  ;;  %v1923_v18 = vrot.slane %v4110_v31, 2  ;;  %v3001_v61 = vpop.eup %3000  ;;  %v2216_v4 = vadd.f32 %v2215_v47, %v2214_v1  ;;  %v2470_v30 = vadd.f32 %v2469_v50, %v2468_v51 }
 0x366   :  { %v1938_v10 = vmax.f32 %v4102_v23, %v4536_v57  ;;  %v2045_v25 = vsub.f32 %v4025_v16, %v1905_v20  ;;  %v1944_v22 = vrot.slane %v4122_v27, 2  ;;  %v3003_v28 = vpop.eup %3002  ;;  %v4164_v11 = vmul.f32 %v3001_v61, %v2460_v8 }
 0x367   :  { %v2231_v26 = vrot.slane %v2230_v54, 1  ;;  %v4166_v7 = vadd.f32 %v2485_v46, %v2484_v35  ;;  %v4168_v19 = vmul.f32 %v3003_v28, %v2446_v34  ;;  %v2217_v23 = vrot.slane %v2216_v4, 1 }
 0x368   :  { %v1939_v5 = vrot.slane %v1938_v10, 1  ;;  %v3005_v62 = vpop.eup %3004  ;;  %v2471_v42 = vrot.slane %v2470_v30, 2  ;;  %v2090_v36 = vmul.f32 1.442695, %v2045_v25  ;;  %v2453_v1 = vadd.f32 %v2452_v40, %v2451_v14 }
 0x369   :  { %v4170_v0 = vmul.f32 %v3005_v62, %v2467_v49  ;;  %v2232_v51 = vadd.f32 %v2231_v26, %v2230_v54  ;;  %v2218_v58 = vadd.f32 %v2217_v23, %v2216_v4  ;;  %v1924_v8 = vmax.f32 %v4110_v31, %v1923_v18  ;;  %v4173_v56 = vpop.f32.mrb[44].mxu1 }
 0x36a   :  { %v1940_v16 = vmax.f32 %v1938_v10, %v1939_v5  ;;  %v2472_v2 = vadd.f32 %v2471_v42, %v2470_v30  ;;  %3010 = vpow2.f32 %v2090_v36  ;;  %v1945_v47 = vmax.f32 %v4122_v27, %v1944_v22  ;;  %v4179_v49 = vpop.f32.mrb[45].mxu1 }
 0x36b   :  { %v1928_v50 = vrot.slane %v4117_v45, 4  ;;  %3012 = vrcp.f32 %v2232_v51  ;;  %v1925_v40 = vrot.slane %v1924_v8, 1  ;;  %v1962_v20 = vsel %vm127_vm0, %v4093_v48, -inf  ;;  %v4183_v54 = vpop.f32.mrb[46].mxu1 }
 0x36c   :  { %v2050_v34 = vsub.f32 %v4059_v38, %v1940_v16  ;;  %v2473_v14 = vrot.slane %v2472_v2, 1  ;;  %v1946_v57 = vrot.slane %v1945_v47, 1  ;;  %v1963_v38 = vrot.slane %v1962_v20, 4  ;;  %v4186_v18 = vpop.f32.mrb[47].mxu1 }
 0x36d   :  { %v3007_v31 = vpop.eup %3006  ;;  %v1929_v10 = vmax.f32 %v4117_v45, %v1928_v50  ;;  %3014 = vrcp.f32 %v2218_v58  ;;  %v1926_v4 = vmax.f32 %v1924_v8, %v1925_v40  ;;  %v1948_v30 = vsel %vm127_vm0, %v4097_v6, -inf }
 0x36e   :  { %v2100_v46 = vmul.f32 1.442695, %v2050_v34  ;;  %v3009_v27 = vpop.eup %3008  ;;  %v4188_v61 = vmul.f32 %v3007_v31, %v2453_v1  ;;  %v1947_v28 = vmax.f32 %v1945_v47, %v1946_v57  ;;  %v1964_v62 = vmax.f32 %v1962_v20, %v1963_v38 }
 0x36f   :  { %v2233_v25 = vsel %vm127_vm0, %v3009_v27, 0.0  ;;  %v2367_v22 = vmul.f32 %v3009_v27, %v3877_v29  ;;  %v2048_v45 = vsub.f32 %v4063_v55, %v1926_v4  ;;  %v1930_v5 = vrot.slane %v1929_v10, 2 }
 0x370   :  { %3016 = vpow2.f32 %v2100_v46  ;;  %v2234_v26 = vrot.slane %v2233_v25, 4  ;;  %v2051_v42 = vsub.f32 %v4067_v32, %v1947_v28  ;;  %v1949_v36 = vrot.slane %v1948_v30, 4 }
 0x371   :  { %v2489_v23 = vsel %vm127_vm0, %v2367_v22, 0.0  ;;  %v1969_v1 = vsel %vm127_vm0, %v4104_v9, -inf  ;;  %v2096_v58 = vmul.f32 1.442695, %v2048_v45  ;;  %v1931_v8 = vmax.f32 %v1929_v10, %v1930_v5 }
 0x372   :  { %v2235_v51 = vadd.f32 %v2234_v26, %v2233_v25  ;;  %v2490_v16 = vrot.slane %v2489_v23, 4  ;;  %v2102_v29 = vmul.f32 1.442695, %v2051_v42  ;;  %v1965_v34 = vrot.slane %v1964_v62, 2 }
 0x373   :  { %v1950_v47 = vmax.f32 %v1948_v30, %v1949_v36  ;;  %v1970_v50 = vrot.slane %v1969_v1, 4  ;;  %3018 = vpow2.f32 %v2096_v58  ;;  %v1932_v20 = vrot.slane %v1931_v8, 1 }
 0x374   :  { %v3011_v40 = vpop.eup %3010  ;;  %v2236_v55 = vrot.slane %v2235_v51, 2  ;;  %v2491_v31 = vadd.f32 %v2490_v16, %v2489_v23  ;;  %3020 = vpow2.f32 %v2102_v29  ;;  %v1966_v57 = vmax.f32 %v1964_v62, %v1965_v34 }
 0x375   :  { %v2219_v46 = vsel %vm127_vm0, %v3011_v40, 0.0  ;;  %v2365_v32 = vmul.f32 %v3011_v40, %v3867_v17  ;;  %v4201_v38 = vpop.eup %3012  ;;  %v1933_v25 = vmax.f32 %v1931_v8, %v1932_v20  ;;  %v4203_v22 = vadd.f32 %v2473_v14, %v2472_v2 }
 0x376   :  { %v2237_v27 = vadd.f32 %v2236_v55, %v2235_v51  ;;  %v2492_v4 = vrot.slane %v2491_v31, 2  ;;  %v2220_v10 = vrot.slane %v2219_v46, 4  ;;  %v1967_v28 = vrot.slane %v1966_v57, 1 }
 0x377   :  { %v2475_v30 = vsel %vm127_vm0, %v2365_v32, 0.0  ;;  %v1951_v26 = vrot.slane %v1950_v47, 2  ;;  %v4206_v45 = vpop.eup %3014  ;;  %v1971_v17 = vmax.f32 %v1969_v1, %v1970_v50  ;;  %v2049_v51 = vsub.f32 %v4069_v24, %v1933_v25 }
 0x378   :  { %v2238_v5 = vrot.slane %v2237_v27, 1  ;;  %v2221_v23 = vadd.f32 %v2220_v10, %v2219_v46  ;;  %v2476_v42 = vrot.slane %v2475_v30, 4  ;;  %v4208_v62 = vadd.f32 %v2492_v4, %v2491_v31 }
 0x379   :  { %v1968_v16 = vmax.f32 %v1966_v57, %v1967_v28  ;;  %v1952_v58 = vmax.f32 %v1950_v47, %v1951_v26  ;;  %v2098_v55 = vmul.f32 1.442695, %v2049_v51  ;;  %v1972_v31 = vrot.slane %v1971_v17, 2 }
 0x37a   :  { %v3017_v36 = vpop.eup %3016  ;;  %v2239_v8 = vadd.f32 %v2238_v5, %v2237_v27  ;;  %v2222_v2 = vrot.slane %v2221_v23, 2  ;;  %v2477_v14 = vadd.f32 %v2476_v42, %v2475_v30 }
 0x37b   :  { %v2254_v29 = vsel %vm127_vm0, %v3017_v36, 0.0  ;;  %v2370_v40 = vmul.f32 %v3017_v36, %v3890_v60  ;;  %v2054_v20 = vsub.f32 %v4093_v48, %v1968_v16  ;;  %v1953_v50 = vrot.slane %v1952_v58, 1 }
 0x37c   :  { %v2255_v34 = vrot.slane %v2254_v29, 4  ;;  %v2223_v46 = vadd.f32 %v2222_v2, %v2221_v23  ;;  %v2478_v1 = vrot.slane %v2477_v14, 2  ;;  %3022 = vpow2.f32 %v2098_v55 }
 0x37d   :  { %v2510_v24 = vsel %vm127_vm0, %v2370_v40, 0.0  ;;  %v2108_v47 = vmul.f32 1.442695, %v2054_v20  ;;  %v3019_v57 = vpop.eup %3018  ;;  %3024 = vrcp.f32 %v2239_v8  ;;  %v1954_v23 = vmax.f32 %v1952_v58, %v1953_v50 }
 0x37e   :  { %v2256_v32 = vadd.f32 %v2255_v34, %v2254_v29  ;;  %v2224_v27 = vrot.slane %v2223_v46, 1  ;;  %v2479_v4 = vadd.f32 %v2478_v1, %v2477_v14  ;;  %v2511_v10 = vrot.slane %v2510_v24, 4  ;;  %v3021_v25 = vpop.eup %3020 }
 0x37f   :  { %v2240_v60 = vsel %vm127_vm0, %v3019_v57, 0.0  ;;  %v2368_v48 = vmul.f32 %v3019_v57, %v3882_v33  ;;  %3026 = vpow2.f32 %v2108_v47  ;;  %v2261_v51 = vsel %vm127_vm0, %v3021_v25, 0.0 }
 0x380   :  { %v2257_v30 = vrot.slane %v2256_v32, 2  ;;  %v2480_v28 = vrot.slane %v2479_v4, 1  ;;  %v2512_v26 = vadd.f32 %v2511_v10, %v2510_v24  ;;  %v2241_v5 = vrot.slane %v2240_v60, 4 }
 0x381   :  { %v2496_v36 = vsel %vm127_vm0, %v2368_v48, 0.0  ;;  %v2371_v16 = vmul.f32 %v3021_v25, %v3895_v41  ;;  %v2225_v8 = vadd.f32 %v2224_v27, %v2223_v46  ;;  %v2262_v33 = vrot.slane %v2261_v51, 4 }
 0x382   :  { %v2258_v42 = vadd.f32 %v2257_v30, %v2256_v32  ;;  %v4220_v2 = vadd.f32 %v2480_v28, %v2479_v4  ;;  %v2513_v14 = vrot.slane %v2512_v26, 2  ;;  %v2242_v29 = vadd.f32 %v2241_v5, %v2240_v60 }
 0x383   :  { %v2497_v40 = vrot.slane %v2496_v36, 4  ;;  %v2517_v55 = vsel %vm127_vm0, %v2371_v16, 0.0  ;;  %v2052_v50 = vsub.f32 %v4097_v6, %v1954_v23  ;;  %v2263_v47 = vadd.f32 %v2262_v33, %v2261_v51 }
 0x384   :  { %v2259_v34 = vrot.slane %v2258_v42, 1  ;;  %v2514_v20 = vadd.f32 %v2513_v14, %v2512_v26  ;;  %v2243_v1 = vrot.slane %v2242_v29, 2  ;;  %v2518_v58 = vrot.slane %v2517_v55, 4 }
 0x385   :  { %v2498_v24 = vadd.f32 %v2497_v40, %v2496_v36  ;;  %v1973_v57 = vmax.f32 %v1971_v17, %v1972_v31  ;;  %3028 = vrcp.f32 %v2225_v8  ;;  %v2264_v25 = vrot.slane %v2263_v47, 2 }
 0x386   :  { %v2260_v32 = vadd.f32 %v2259_v34, %v2258_v42  ;;  %v2515_v41 = vrot.slane %v2514_v20, 1  ;;  %v2244_v46 = vadd.f32 %v2243_v1, %v2242_v29  ;;  %v2519_v27 = vadd.f32 %v2518_v58, %v2517_v55  ;;  %v3023_v4 = vpop.eup %3022 }
 0x387   :  { %v2499_v10 = vrot.slane %v2498_v24, 2  ;;  %v2104_v30 = vmul.f32 1.442695, %v2052_v50  ;;  %v4224_v60 = vpop.eup %3024  ;;  %v2247_v26 = vsel %vm127_vm0, %v3023_v4, 0.0  ;;  %v1974_v6 = vrot.slane %v1973_v57, 1 }
 0x388   :  { %3030 = vrcp.f32 %v2260_v32  ;;  %v2245_v48 = vrot.slane %v2244_v46, 1  ;;  %v2520_v28 = vrot.slane %v2519_v27, 2  ;;  %v2265_v42 = vadd.f32 %v2264_v25, %v2263_v47 }
 0x389   :  { %v3027_v5 = vpop.eup %3026  ;;  %v2500_v23 = vadd.f32 %v2499_v10, %v2498_v24  ;;  %v2248_v17 = vrot.slane %v2247_v26, 4  ;;  %v2369_v31 = vmul.f32 %v3023_v4, %v3885_v44  ;;  %v2516_v33 = vadd.f32 %v2515_v41, %v2514_v20 }
 0x38a   :  { %v2246_v36 = vadd.f32 %v2245_v48, %v2244_v46  ;;  %v2521_v51 = vadd.f32 %v2520_v28, %v2519_v27  ;;  %v2282_v16 = vsel %vm127_vm0, %v3027_v5, 0.0  ;;  %v2374_v8 = vmul.f32 %v3027_v5, %v3906_v12 }
 0x38b   :  { %v2501_v14 = vrot.slane %v2500_v23, 1  ;;  %v2266_v29 = vrot.slane %v2265_v42, 1  ;;  %v2249_v34 = vadd.f32 %v2248_v17, %v2247_v26  ;;  %v2503_v40 = vsel %vm127_vm0, %v2369_v31, 0.0 }
 0x38c   :  { %3032 = vrcp.f32 %v2246_v36  ;;  %v2504_v55 = vrot.slane %v2503_v40, 4  ;;  %v2283_v1 = vrot.slane %v2282_v16, 4  ;;  %v2522_v50 = vrot.slane %v2521_v51, 1 }
 0x38d   :  { %v2267_v58 = vadd.f32 %v2266_v29, %v2265_v42  ;;  %v2250_v32 = vrot.slane %v2249_v34, 2  ;;  %v2538_v44 = vsel %vm127_vm0, %v2374_v8, 0.0  ;;  %v2502_v24 = vadd.f32 %v2501_v14, %v2500_v23 }
 0x38e   :  { %v2505_v47 = vadd.f32 %v2504_v55, %v2503_v40  ;;  %v2284_v46 = vadd.f32 %v2283_v1, %v2282_v16  ;;  %v2539_v27 = vrot.slane %v2538_v44, 4  ;;  %v1975_v4 = vmax.f32 %v1973_v57, %v1974_v6 }
 0x38f   :  { %3034 = vrcp.f32 %v2267_v58  ;;  %v2251_v12 = vadd.f32 %v2250_v32, %v2249_v34  ;;  %v1955_v10 = vsel %vm127_vm0, %v4112_v13, -inf  ;;  %v4234_v25 = vpop.eup %3028  ;;  %v1990_v42 = vsel %vm127_vm0, %v4140_v15, -inf }
 0x390   :  { %v2506_v20 = vrot.slane %v2505_v47, 2  ;;  %v2285_v41 = vrot.slane %v2284_v46, 2  ;;  %v2540_v48 = vadd.f32 %v2539_v27, %v2538_v44  ;;  %3036 = vpow2.f32 %v2104_v30 }
 0x391   :  { %v2252_v26 = vrot.slane %v2251_v12, 1  ;;  %v2055_v5 = vsub.f32 %v4104_v9, %v1975_v4  ;;  %v1956_v23 = vrot.slane %v1955_v10, 4  ;;  %v1991_v14 = vrot.slane %v1990_v42, 4 }
 0x392   :  { %v3031_v28 = vpop.eup %3030  ;;  %v2507_v57 = vadd.f32 %v2506_v20, %v2505_v47  ;;  %v2286_v6 = vadd.f32 %v2285_v41, %v2284_v46  ;;  %v2541_v31 = vrot.slane %v2540_v48, 2  ;;  %v1976_v9 = vsel %vm127_vm0, %v4142_v43, -inf }
 0x393   :  { %v4239_v17 = vmul.f32 %v3031_v28, %v2516_v33  ;;  %v2253_v36 = vadd.f32 %v2252_v26, %v2251_v12  ;;  %v2110_v16 = vmul.f32 1.442695, %v2055_v5  ;;  %v1957_v8 = vmax.f32 %v1955_v10, %v1956_v23 }
 0x394   :  { %v2508_v29 = vrot.slane %v2507_v57, 1  ;;  %v2287_v34 = vrot.slane %v2286_v6, 1  ;;  %v4241_v30 = vadd.f32 %v2541_v31, %v2540_v48  ;;  %v1992_v55 = vmax.f32 %v1990_v42, %v1991_v14 }
 0x395   :  { %3038 = vrcp.f32 %v2253_v36  ;;  %v1958_v40 = vrot.slane %v1957_v8, 2  ;;  %v1977_v1 = vrot.slane %v1976_v9, 4  ;;  %v2523_v58 = vadd.f32 %v2522_v50, %v2521_v51 }
 0x396   :  { %v3033_v33 = vpop.eup %3032  ;;  %v2509_v32 = vadd.f32 %v2508_v29, %v2507_v57  ;;  %v4245_v44 = vadd.f32 %v2287_v34, %v2286_v6  ;;  %3040 = vpow2.f32 %v2110_v16  ;;  %v1993_v27 = vrot.slane %v1992_v55, 2 }
 0x397   :  { %v4247_v47 = vmul.f32 %v3033_v33, %v2502_v24  ;;  %v1959_v46 = vmax.f32 %v1957_v8, %v1958_v40  ;;  %v1978_v12 = vmax.f32 %v1976_v9, %v1977_v1  ;;  %v1997_v10 = vsel %vm127_vm0, %v4145_v39, -inf }
 0x398   :  { %v1983_v20 = vsel %vm127_vm0, %v4147_v37, -inf  ;;  %v2018_v51 = vsel %vm127_vm0, %v4173_v56, -inf  ;;  %v1994_v48 = vmax.f32 %v1992_v55, %v1993_v27  ;;  %v1998_v24 = vrot.slane %v1997_v10, 4 }
 0x399   :  { %v3035_v50 = vpop.eup %3034  ;;  %v1960_v41 = vrot.slane %v1959_v46, 1  ;;  %v1979_v28 = vrot.slane %v1978_v12, 2  ;;  %v1984_v23 = vrot.slane %v1983_v20, 4  ;;  %v2019_v42 = vrot.slane %v2018_v51, 4 }
 0x39a   :  { %v3037_v26 = vpop.eup %3036  ;;  %v4256_v5 = vmul.f32 %v3035_v50, %v2523_v58  ;;  %v4260_v57 = vsel %vm127_vm0, %v4179_v49, -inf  ;;  %v1995_v16 = vrot.slane %v1994_v48, 1  ;;  %v1999_v29 = vmax.f32 %v1997_v10, %v1998_v24 }
 0x39b   :  { %v2268_v6 = vsel %vm127_vm0, %v3037_v26, 0.0  ;;  %v2372_v31 = vmul.f32 %v3037_v26, %v3898_v63  ;;  %v1961_v36 = vmax.f32 %v1959_v46, %v1960_v41  ;;  %v1980_v14 = vmax.f32 %v1978_v12, %v1979_v28 }
 0x39c   :  { %v2269_v8 = vrot.slane %v2268_v6, 4  ;;  %v1985_v34 = vmax.f32 %v1983_v20, %v1984_v23  ;;  %v1996_v55 = vmax.f32 %v1994_v48, %v1995_v16  ;;  %v2020_v1 = vmax.f32 %v2018_v51, %v2019_v42 }
 0x39d   :  { %v2524_v9 = vsel %vm127_vm0, %v2372_v31, 0.0  ;;  %v2053_v40 = vsub.f32 %v4112_v13, %v1961_v36  ;;  %v1981_v27 = vrot.slane %v1980_v14, 1  ;;  %v2000_v50 = vrot.slane %v1999_v29, 2 }
 0x39e   :  { %v2270_v33 = vadd.f32 %v2269_v8, %v2268_v6  ;;  %v2525_v58 = vrot.slane %v2524_v9, 4  ;;  %v2058_v63 = vsub.f32 %v4140_v15, %v1996_v55  ;;  %v1986_v46 = vrot.slane %v1985_v34, 2 }
 0x39f   :  { %v3039_v4 = vpop.eup %3038  ;;  %v2106_v35 = vmul.f32 1.442695, %v2053_v40  ;;  %v2021_v41 = vrot.slane %v2020_v1, 2  ;;  %v1982_v28 = vmax.f32 %v1980_v14, %v1981_v27  ;;  %v2001_v31 = vmax.f32 %v1999_v29, %v2000_v50 }
 0x3a0   :  { %v3041_v26 = vpop.eup %3040  ;;  %v4267_v12 = vmul.f32 %v3039_v4, %v2509_v32  ;;  %v2271_v10 = vrot.slane %v2270_v33, 2  ;;  %v2526_v20 = vadd.f32 %v2525_v58, %v2524_v9  ;;  %v2116_v48 = vmul.f32 1.442695, %v2058_v63 }
 0x3a1   :  { %v2289_v13 = vsel %vm127_vm0, %v3041_v26, 0.0  ;;  %v2375_v51 = vmul.f32 %v3041_v26, %v3911_v3  ;;  %3042 = vpow2.f32 %v2106_v35  ;;  %v2056_v6 = vsub.f32 %v4142_v43, %v1982_v28 }
 0x3a2   :  { %v2272_v24 = vadd.f32 %v2271_v10, %v2270_v33  ;;  %v2527_v23 = vrot.slane %v2526_v20, 2  ;;  %v2290_v42 = vrot.slane %v2289_v13, 4  ;;  %3044 = vpow2.f32 %v2116_v48 }
 0x3a3   :  { %v2545_v15 = vsel %vm127_vm0, %v2375_v51, 0.0  ;;  %v1987_v32 = vmax.f32 %v1985_v34, %v1986_v46  ;;  %v2112_v14 = vmul.f32 1.442695, %v2056_v6  ;;  %v2002_v9 = vrot.slane %v2001_v31, 1 }
 0x3a4   :  { %v2273_v4 = vrot.slane %v2272_v24, 1  ;;  %v2528_v36 = vadd.f32 %v2527_v23, %v2526_v20  ;;  %v2291_v16 = vadd.f32 %v2290_v42, %v2289_v13  ;;  %v2546_v8 = vrot.slane %v2545_v15, 4 }
 0x3a5   :  { %v1988_v40 = vrot.slane %v1987_v32, 1  ;;  %v2022_v3 = vmax.f32 %v2020_v1, %v2021_v41  ;;  %3046 = vpow2.f32 %v2112_v14  ;;  %v2003_v27 = vmax.f32 %v2001_v31, %v2002_v9 }
 0x3a6   :  { %v2274_v35 = vadd.f32 %v2273_v4, %v2272_v24  ;;  %v2529_v55 = vrot.slane %v2528_v36, 1  ;;  %v2292_v33 = vrot.slane %v2291_v16, 2  ;;  %v2547_v58 = vadd.f32 %v2546_v8, %v2545_v15 }
 0x3a7   :  { %v1989_v43 = vmax.f32 %v1987_v32, %v1988_v40  ;;  %v2023_v63 = vrot.slane %v2022_v3, 1  ;;  %3048 = vrcp.f32 %v4245_v44  ;;  %v2059_v46 = vsub.f32 %v4145_v39, %v2003_v27 }
 0x3a8   :  { %v4274_v29 = vadd.f32 %v2529_v55, %v2528_v36  ;;  %v2293_v34 = vadd.f32 %v2292_v33, %v2291_v16  ;;  %v2548_v50 = vrot.slane %v2547_v58, 2  ;;  %v2005_v1 = vrot.slane %v4260_v57, 4 }
 0x3a9   :  { %v2057_v26 = vsub.f32 %v4147_v37, %v1989_v43  ;;  %v2024_v10 = vmax.f32 %v2022_v3, %v2023_v63  ;;  %3050 = vrcp.f32 %v2274_v35  ;;  %v2025_v28 = vsel %vm127_vm0, %v4183_v54, -inf  ;;  %v4537_v63 = vld [vmem:[#allocation13_spill] sm:$0xff] }
 0x3aa   :  { %v2294_v41 = vrot.slane %v2293_v34, 1  ;;  %v4279_v20 = vadd.f32 %v2548_v50, %v2547_v58  ;;  %v2118_v44 = vmul.f32 1.442695, %v2059_v46  ;;  %v2006_v24 = vmax.f32 %v4260_v57, %v2005_v1 }
 0x3ab   :  { %v3043_v13 = vpop.eup %3042  ;;  %v2114_v51 = vmul.f32 1.442695, %v2057_v26  ;;  %v2062_v48 = vsub.f32 %v4173_v56, %v2024_v10  ;;  %v2026_v23 = vrot.slane %v2025_v28, 4  ;;  %v4289_v42 = vsel %vm127_vm0, %v4186_v18, -inf }
 0x3ac   :  { %v2275_v39 = vsel %vm127_vm0, %v3043_v13, 0.0  ;;  %v2373_v37 = vmul.f32 %v3043_v13, %v3901_v59  ;;  %v3045_v6 = vpop.eup %3044  ;;  %3052 = vpow2.f32 %v2118_v44  ;;  %v2007_v32 = vrot.slane %v2006_v24, 2 }
 0x3ad   :  { %v2276_v15 = vrot.slane %v2275_v39, 4  ;;  %v2124_v31 = vmul.f32 1.442695, %v2062_v48  ;;  %v2295_v4 = vadd.f32 %v2294_v41, %v2293_v34  ;;  %v2310_v56 = vsel %vm127_vm0, %v3045_v6, 0.0 }
 0x3ae   :  { %v2531_v36 = vsel %vm127_vm0, %v2373_v37, 0.0  ;;  %v2378_v57 = vmul.f32 %v3045_v6, %v3924_v21  ;;  %v2311_v59 = vrot.slane %v2310_v56, 4  ;;  %3054 = vpow2.f32 %v2114_v51 }
 0x3af   :  { %v2277_v16 = vadd.f32 %v2276_v15, %v2275_v39  ;;  %v2532_v8 = vrot.slane %v2531_v36, 4  ;;  %3056 = vpow2.f32 %v2124_v31  ;;  %v2008_v9 = vmax.f32 %v2006_v24, %v2007_v32  ;;  %v3047_v3 = vpop.eup %3046 }
 0x3b0   :  { %v2566_v14 = vsel %vm127_vm0, %v2378_v57, 0.0  ;;  %v2027_v40 = vmax.f32 %v2025_v28, %v2026_v23  ;;  %v2312_v33 = vadd.f32 %v2311_v59, %v2310_v56  ;;  %v2296_v43 = vsel %vm127_vm0, %v3047_v3, 0.0 }
 0x3b1   :  { %v2278_v35 = vrot.slane %v2277_v16, 2  ;;  %v2533_v55 = vadd.f32 %v2532_v8, %v2531_v36  ;;  %v2567_v58 = vrot.slane %v2566_v14, 4  ;;  %v4295_v27 = vpop.eup %3048  ;;  %v2376_v21 = vmul.f32 %v3047_v3, %v4537_v63 }
 0x3b2   :  { %v2009_v34 = vrot.slane %v2008_v9, 1  ;;  %v2028_v50 = vrot.slane %v2027_v40, 2  ;;  %v2313_v10 = vrot.slane %v2312_v33, 2  ;;  %v2297_v28 = vrot.slane %v2296_v43, 4 }
 0x3b3   :  { %v2279_v46 = vadd.f32 %v2278_v35, %v2277_v16  ;;  %v2534_v26 = vrot.slane %v2533_v55, 2  ;;  %v2568_v1 = vadd.f32 %v2567_v58, %v2566_v14  ;;  %v4299_v41 = vpop.eup %3050  ;;  %v2552_v13 = vsel %vm127_vm0, %v2376_v21, 0.0  ;;  %v4538_v14 = vld [vmem:[#allocation15_spill] sm:$0xff] }
 0x3b4   :  { %v2010_v44 = vmax.f32 %v2008_v9, %v2009_v34  ;;  %v2029_v51 = vmax.f32 %v2027_v40, %v2028_v50  ;;  %v2314_v39 = vadd.f32 %v2313_v10, %v2312_v33  ;;  %3058 = vrcp.f32 %v2295_v4 }
 0x3b5   :  { %v2280_v48 = vrot.slane %v2279_v46, 1  ;;  %v2535_v24 = vadd.f32 %v2534_v26, %v2533_v55  ;;  %v2569_v37 = vrot.slane %v2568_v1, 2  ;;  %v2298_v23 = vadd.f32 %v2297_v28, %v2296_v43  ;;  %v4539_v28 = vld [vmem:[#allocation14_spill] sm:$0xff] }
 0x3b6   :  { %v2553_v6 = vrot.slane %v2552_v13, 4  ;;  %v2060_v15 = vsub.f32 %v4179_v49, %v2010_v44  ;;  %v3053_v31 = vpop.eup %3052  ;;  %v2315_v56 = vrot.slane %v2314_v39, 1  ;;  %v2030_v4 = vrot.slane %v2029_v51, 1 }
 0x3b7   :  { %v2281_v32 = vadd.f32 %v2280_v48, %v2279_v46  ;;  %v2536_v36 = vrot.slane %v2535_v24, 1  ;;  %v2570_v57 = vadd.f32 %v2569_v37, %v2568_v1  ;;  %v2299_v16 = vrot.slane %v2298_v23, 2  ;;  %v4540_v48 = vld [vmem:[#allocation19_spill] sm:$0xff] }
 0x3b8   :  { %v2554_v8 = vadd.f32 %v2553_v6, %v2552_v13  ;;  %v2317_v59 = vsel %vm127_vm0, %v3053_v31, 0.0  ;;  %v2379_v9 = vmul.f32 %v3053_v31, %v4538_v14  ;;  %v3055_v40 = vpop.eup %3054  ;;  %v2316_v3 = vadd.f32 %v2315_v56, %v2314_v39 }
 0x3b9   :  { %3060 = vrcp.f32 %v2281_v32  ;;  %v2571_v35 = vrot.slane %v2570_v57, 1  ;;  %v3057_v55 = vpop.eup %3056  ;;  %v2300_v33 = vadd.f32 %v2299_v16, %v2298_v23  ;;  %v2318_v49 = vrot.slane %v2317_v59, 4 }
 0x3ba   :  { %v2555_v58 = vrot.slane %v2554_v8, 2  ;;  %v2573_v43 = vsel %vm127_vm0, %v2379_v9, 0.0  ;;  %v4306_v63 = vadd.f32 %v2536_v36, %v2535_v24  ;;  %3062 = vrcp.f32 %v2316_v3 }
 0x3bb   :  { %v2574_v21 = vrot.slane %v2573_v43, 4  ;;  %v2303_v34 = vsel %vm127_vm0, %v3055_v40, 0.0  ;;  %v2301_v50 = vrot.slane %v2300_v33, 1  ;;  %v2319_v26 = vadd.f32 %v2318_v49, %v2317_v59 }
 0x3bc   :  { %v2556_v46 = vadd.f32 %v2555_v58, %v2554_v8  ;;  %v2304_v10 = vrot.slane %v2303_v34, 4  ;;  %v2377_v13 = vmul.f32 %v3055_v40, %v4539_v28  ;;  %v2338_v44 = vsel %vm127_vm0, %v3057_v55, 0.0 }
 0x3bd   :  { %v2575_v1 = vadd.f32 %v2574_v21, %v2573_v43  ;;  %v2382_v39 = vmul.f32 %v3057_v55, %v4540_v48  ;;  %v2572_v37 = vadd.f32 %v2571_v35, %v2570_v57  ;;  %v2302_v23 = vadd.f32 %v2301_v50, %v2300_v33 }
 0x3be   :  { %v2320_v6 = vrot.slane %v2319_v26, 2  ;;  %v2305_v24 = vadd.f32 %v2304_v10, %v2303_v34  ;;  %v2559_v32 = vsel %vm127_vm0, %v2377_v13, 0.0  ;;  %v2339_v36 = vrot.slane %v2338_v44, 4  ;;  %v4314_v16 = vpop.eup %3058 }
 0x3bf   :  { %v2576_v31 = vrot.slane %v2575_v1, 2  ;;  %v2594_v56 = vsel %vm127_vm0, %v2382_v39, 0.0  ;;  %v2557_v8 = vrot.slane %v2556_v46, 1  ;;  %3064 = vrcp.f32 %v2302_v23 }
 0x3c0   :  { %v2321_v59 = vadd.f32 %v2320_v6, %v2319_v26  ;;  %v2306_v14 = vrot.slane %v2305_v24, 2  ;;  %v2560_v40 = vrot.slane %v2559_v32, 4  ;;  %v2340_v3 = vadd.f32 %v2339_v36, %v2338_v44 }
 0x3c1   :  { %v2577_v9 = vadd.f32 %v2576_v31, %v2575_v1  ;;  %v2595_v55 = vrot.slane %v2594_v56, 4  ;;  %v2120_v33 = vmul.f32 1.442695, %v2060_v15  ;;  %v2031_v58 = vmax.f32 %v2029_v51, %v2030_v4 }
 0x3c2   :  { %v2322_v57 = vrot.slane %v2321_v59, 1  ;;  %v2307_v35 = vadd.f32 %v2306_v14, %v2305_v24  ;;  %v2561_v21 = vadd.f32 %v2560_v40, %v2559_v32  ;;  %v2341_v34 = vrot.slane %v2340_v3, 2 }
 0x3c3   :  { %v3061_v49 = vpop.eup %3060  ;;  %v2578_v43 = vrot.slane %v2577_v9, 1  ;;  %v2596_v50 = vadd.f32 %v2595_v55, %v2594_v56  ;;  %3066 = vpow2.f32 %v2120_v33  ;;  %v2063_v13 = vsub.f32 %v4183_v54, %v2031_v58 }
 0x3c4   :  { %v2323_v10 = vadd.f32 %v2322_v57, %v2321_v59  ;;  %v2308_v28 = vrot.slane %v2307_v35, 1  ;;  %v3063_v26 = vpop.eup %3062  ;;  %v2558_v48 = vadd.f32 %v2557_v8, %v2556_v46  ;;  %v2562_v1 = vrot.slane %v2561_v21, 2 }
 0x3c5   :  { %v2342_v39 = vadd.f32 %v2341_v34, %v2340_v3  ;;  %v2597_v44 = vrot.slane %v2596_v50, 2  ;;  %v4317_v23 = vmul.f32 %v3063_v26, %v2572_v37  ;;  %v2126_v51 = vmul.f32 1.442695, %v2063_v13  ;;  %v4545_v34 = vld [vmem:[#allocation26_spill] sm:$0xff]  ;;  %v4548_v13 = vld [vmem:[#allocation25_spill] sm:$0xff] }
 0x3c6   :  { %3068 = vrcp.f32 %v2323_v10  ;;  %v2309_v15 = vadd.f32 %v2308_v28, %v2307_v35  ;;  %v2563_v4 = vadd.f32 %v2562_v1, %v2561_v21  ;;  %v2012_v31 = vrot.slane %v4289_v42, 4  ;;  %v4544_v21 = vld [vmem:[#allocation23_spill] sm:$0xff]  ;;  %v4547_v10 = vld [vmem:[#allocation28_spill] sm:$0xff] }
 0x3c7   :  { %v2343_v6 = vrot.slane %v2342_v39, 1  ;;  %v2598_v24 = vadd.f32 %v2597_v44, %v2596_v50  ;;  %v2579_v32 = vadd.f32 %v2578_v43, %v2577_v9  ;;  %v4541_v54 = vrot.slane %v4065_v53, 1  ;;  %v4546_v50 = vld [vmem:[#allocation24_spill] sm:$0xff] }
 0x3c8   :  { %3070 = vrcp.f32 %v2309_v15  ;;  %v2438_v46 = vrot.slane %v4078_v52, 1  ;;  %v2564_v56 = vrot.slane %v2563_v4, 1  ;;  %v4542_v37 = vrot.slane %v4166_v7, 1 }
 0x3c9   :  { %v2432_v36 = vadd.f32 %v4541_v54, %v4065_v53  ;;  %v2344_v8 = vadd.f32 %v2343_v6, %v2342_v39  ;;  %3072 = vpow2.f32 %v2126_v51  ;;  %v3065_v14 = vpop.eup %3064  ;;  %v2599_v40 = vrot.slane %v2598_v24, 1  ;;  %v4550_v51 = vld [vmem:[#allocation17_spill] sm:$0xff] }
 0x3ca   :  { %v2488_v59 = vadd.f32 %v4542_v37, %v4166_v7  ;;  %v2013_v3 = vmax.f32 %v4289_v42, %v2012_v31  ;;  %v2439_v9 = vadd.f32 %v2438_v46, %v4078_v52  ;;  %v2494_v55 = vrot.slane %v4208_v62, 1  ;;  %v4552_v37 = vld [vmem:[#allocation22_spill] sm:$0xff] }
 0x3cb   :  { %v4330_v57 = vmul.f32 %v3065_v14, %v2558_v48  ;;  %3074 = vrcp.f32 %v2344_v8  ;;  %v4543_v53 = vrot.slane %v4241_v30, 1  ;;  %v2550_v33 = vrot.slane %v4279_v20, 1  ;;  %v4549_v48 = vld [vmem:[#allocation27_spill] sm:$0xff]  ;;  %v4551_v8 = vld [vmem:[#allocation20_spill] sm:$0xff] }
 0x3cc   :  { %v2565_v58 = vadd.f32 %v2564_v56, %v2563_v4  ;;  %v2014_v43 = vrot.slane %v2013_v3, 2  ;;  %v2495_v7 = vadd.f32 %v2494_v55, %v4208_v62  ;;  %v2644_v42 = vmul.f32 %v4545_v34, %v4544_v21 }
 0x3cd   :  { %v2544_v35 = vadd.f32 %v4543_v53, %v4241_v30  ;;  %v2551_v52 = vadd.f32 %v2550_v33, %v4279_v20  ;;  %v2645_v28 = vmul.f32 %v4547_v10, %v4546_v50  ;;  %v2646_v26 = vmul.f32 %v4548_v13, %v2432_v36  ;;  %v3067_v39 = vpop.eup %3066  ;;  %v4554_v33 = vld [vmem:[#allocation16_spill] sm:$0xff] }
 0x3ce   :  { %v2647_v1 = vmul.f32 %v4549_v48, %v2439_v9  ;;  %v2015_v30 = vmax.f32 %v2013_v3, %v2014_v43  ;;  %v4346_v44 = vmul.f32 %v4206_v45, %v4203_v22  ;;  %v4350_v62 = vmul.f32 %v4234_v25, %v4220_v2  ;;  %v4553_v3 = vld [vmem:[#allocation12_spill] sm:$0xff] }
 0x3cf   :  { %v4353_v15 = vmul.f32 %v4201_v38, %v2488_v59  ;;  %v2324_v20 = vsel %vm127_vm0, %v3067_v39, 0.0  ;;  %v2380_v4 = vmul.f32 %v3067_v39, %v4550_v51  ;;  %v4358_v6 = vmul.f32 %v4224_v60, %v2495_v7 }
 0x3d0   :  { %v4362_v31 = vmul.f32 %v4299_v41, %v4274_v29  ;;  %v3069_v22 = vpop.eup %3068  ;;  %v2325_v45 = vrot.slane %v2324_v20, 4  ;;  %v2016_v54 = vrot.slane %v2015_v30, 1  ;;  %v4365_v2 = vmul.f32 %v3061_v49, %v4306_v63 }
 0x3d1   :  { %v4368_v38 = vmul.f32 %v4295_v27, %v2544_v35  ;;  %v4370_v25 = vmul.f32 %v3069_v22, %v2579_v32  ;;  %v2580_v36 = vsel %vm127_vm0, %v2380_v4, 0.0  ;;  %v4374_v60 = vmul.f32 %v4314_v16, %v2551_v52  ;;  %v4555_v52 = vld [vmem:[#allocation21_spill] sm:$0xff] }
 0x3d2   :  { %v3071_v46 = vpop.eup %3070  ;;  %v2326_v29 = vadd.f32 %v2325_v45, %v2324_v20  ;;  %v2581_v41 = vrot.slane %v2580_v36, 4  ;;  %v2017_v56 = vmax.f32 %v2015_v30, %v2016_v54  ;;  %v2705_v63 = vsel %vm2704_vm4, %v4552_v37, %v4551_v8 }
 0x3d3   :  { %v3073_v49 = vpop.eup %3072  ;;  %v2665_v59 = vmul.f32 %v3071_v46, %v2565_v58  ;;  %v2600_v27 = vadd.f32 %v2599_v40, %v2598_v24  ;;  %v2707_v43 = vsel %vm2706_vm5, %v4554_v33, %v2705_v63  ;;  %v2718_v45 = vsel %vm2704_vm4, %v4188_v61, %v4168_v19 }
 0x3d4   :  { %v2327_v32 = vrot.slane %v2326_v29, 2  ;;  %v2345_v14 = vsel %vm127_vm0, %v3073_v49, 0.0  ;;  %v2383_v16 = vmul.f32 %v3073_v49, %v4553_v3  ;;  %v2582_v55 = vadd.f32 %v2581_v41, %v2580_v36 }
 0x3d5   :  { %v3075_v9 = vpop.eup %3074  ;;  %v2346_v53 = vrot.slane %v2345_v14, 4  ;;  %v2061_v35 = vsub.f32 %v4186_v18, %v2017_v56  ;;  %v2709_v50 = vsel %vm2708_vm6, %v4555_v52, %v2707_v43  ;;  %v2732_v61 = vsel %vm2704_vm4, %v2665_v59, %v4330_v57  ;;  %v4556_v56 = vld [vmem:[#allocation18_spill] sm:$0xff] }
 0x3d6   :  { %v2328_v7 = vadd.f32 %v2327_v32, %v2326_v29  ;;  %v2601_v58 = vsel %vm127_vm0, %v2383_v16, 0.0  ;;  %v4385_v24 = vmul.f32 %v3075_v9, %v2600_v27  ;;  %v2711_v13 = vsel %vm2710_vm7, %v2644_v42, %v2709_v50 }
 0x3d7   :  { %v2347_v40 = vadd.f32 %v2346_v53, %v2345_v14  ;;  %v2602_v21 = vrot.slane %v2601_v58, 4  ;;  %v2122_v34 = vmul.f32 1.442695, %v2061_v35  ;;  %v2583_v18 = vrot.slane %v2582_v55, 2 }
 0x3d8   :  { %v2329_v10 = vrot.slane %v2328_v7, 1  ;;  %v2713_v39 = vsel %vm2712_vm8, %v2645_v28, %v2711_v13  ;;  %v2719_v42 = vsel %vm2706_vm5, %v4164_v11, %v2718_v45  ;;  %v2725_v28 = vsel %vm2704_vm4, %v4267_v12, %v4247_v47 }
 0x3d9   :  { %v2348_v48 = vrot.slane %v2347_v40, 2  ;;  %3076 = vpow2.f32 %v2122_v34  ;;  %v2603_v20 = vadd.f32 %v2602_v21, %v2601_v58  ;;  %v2715_v51 = vsel %vm2714_vm9, %v2646_v26, %v2713_v39 }
 0x3da   :  { %v2330_v30 = vadd.f32 %v2329_v10, %v2328_v7  ;;  %v2717_v22 = vsel %vm2716_vm10, %v2647_v1, %v2715_v51  ;;  %v2584_v54 = vadd.f32 %v2583_v18, %v2582_v55  ;;  %v2720_v36 = vsel %vm2708_vm6, %v4170_v0, %v2719_v42 }
 0x3db   :  { %v2349_v4 = vadd.f32 %v2348_v48, %v2347_v40  ;;  %2743 = vst.msk [vmem:[#allocation8] sm:$0xff] %vm127_vm0, %v2717_v22  ;;  %v2726_v1 = vsel %vm2706_vm5, %v4239_v17, %v2725_v28  ;;  %v2604_v46 = vrot.slane %v2603_v20, 2  ;;  %v2721_v19 = vsel %vm2710_vm7, %v4346_v44, %v2720_v36 }
 0x3dc   :  { %3078 = vrcp.f32 %v2330_v30  ;;  %v2727_v11 = vsel %vm2708_vm6, %v4256_v5, %v2726_v1  ;;  %v2722_v12 = vsel %vm2712_vm8, %v4350_v62, %v2721_v19  ;;  %v2733_v44 = vsel %vm2706_vm5, %v4317_v23, %v2732_v61 }
 0x3dd   :  { %v2350_v26 = vrot.slane %v2349_v4, 1  ;;  %v2728_v0 = vsel %vm2710_vm7, %v4362_v31, %v2727_v11  ;;  %v2723_v17 = vsel %vm2714_vm9, %v4353_v15, %v2722_v12  ;;  %v2585_v5 = vrot.slane %v2584_v54, 1 }
 0x3de   :  { %v2729_v29 = vsel %vm2712_vm8, %v4365_v2, %v2728_v0  ;;  %v2724_v57 = vsel %vm2716_vm10, %v4358_v6, %v2723_v17  ;;  %v2605_v41 = vadd.f32 %v2604_v46, %v2603_v20  ;;  %v2734_v15 = vsel %vm2708_vm6, %v4370_v25, %v2733_v44 }
 0x3df   :  { %v2351_v47 = vadd.f32 %v2350_v26, %v2349_v4  ;;  %v2730_v62 = vsel %vm2714_vm9, %v4368_v38, %v2729_v29  ;;  %2744 = vst.msk [vmem:[#allocation8 + $0x8] sm:$0xff] %vm127_vm0, %v2724_v57  ;;  %v2586_v6 = vadd.f32 %v2585_v5, %v2584_v54 }
 0x3e0   :  { %v2731_v31 = vsel %vm2716_vm10, %v4374_v60, %v2730_v62  ;;  %v2606_v49 = vrot.slane %v2605_v41, 1 }
 0x3e1   :  { %3080 = vrcp.f32 %v2351_v47  ;;  %2745 = vst.msk [vmem:[#allocation8 + $0x10] sm:$0xff] %vm127_vm0, %v2731_v31 }
 0x3e2   :  { %v2607_v3 = vadd.f32 %v2606_v49, %v2605_v41 }
 0x3e3   :  { %v3077_v2 = vpop.eup %3076 }
 0x3e4   :  { %v2331_v23 = vsel %vm127_vm0, %v3077_v2, 0.0  ;;  %v2381_v8 = vmul.f32 %v3077_v2, %v4556_v56 }
 0x3e5   :  { %v2332_v37 = vrot.slane %v2331_v23, 4 }
 0x3e6   :  { %v3079_v63 = vpop.eup %3078  ;;  %v2587_v38 = vsel %vm127_vm0, %v2381_v8, 0.0 }
 0x3e7   :  { %v2333_v59 = vadd.f32 %v2332_v37, %v2331_v23  ;;  %v2588_v60 = vrot.slane %v2587_v38, 4  ;;  %v2668_v27 = vmul.f32 %v3079_v63, %v2586_v6 }
 0x3e9   :  { %v2334_v32 = vrot.slane %v2333_v59, 2  ;;  %v2735_v25 = vsel %vm2710_vm7, %v2668_v27, %v2734_v15  ;;  %v2589_v14 = vadd.f32 %v2588_v60, %v2587_v38 }
 0x3eb   :  { %v3081_v16 = vpop.eup %3080  ;;  %v2335_v9 = vadd.f32 %v2334_v32, %v2333_v59  ;;  %v2590_v35 = vrot.slane %v2589_v14, 2 }
 0x3ec   :  { %v2671_v55 = vmul.f32 %v3081_v16, %v2607_v3 }
 0x3ed   :  { %v2336_v53 = vrot.slane %v2335_v9, 1  ;;  %v2591_v43 = vadd.f32 %v2590_v35, %v2589_v14 }
 0x3ef   :  { %v2337_v33 = vadd.f32 %v2336_v53, %v2335_v9  ;;  %v2592_v7 = vrot.slane %v2591_v43, 1 }
 0x3f1   :  { %3082 = vrcp.f32 %v2337_v33  ;;  %v2593_v58 = vadd.f32 %v2592_v7, %v2591_v43 }
 0x3fb   :  { %v3083_v40 = vpop.eup %3082 }
 0x3fc   :  { %v2669_v21 = vmul.f32 %v3083_v40, %v2593_v58 }
 0x3fe   :  { %v2736_v34 = vsel %vm2712_vm8, %v2669_v21, %v2735_v25 }
 0x3ff   :  { %v2737_v52 = vsel %vm2714_vm9, %v4385_v24, %v2736_v34 }
 0x400   :  { %v2738_v50 = vsel %vm2716_vm10, %v2671_v55, %v2737_v52 }
 0x401   :  { %2746 = vst.msk [vmem:[#allocation8 + $0x18] sm:$0xff] %vm127_vm0, %v2738_v50 }
 0x402   :  { %3161 = shalt.err (!%p3158_p0)
}
 0x403   :  { %s3162_s26 = scalar_lea.hbm %s4465_s9, 512 }
 0x404   :  { %p3163_p1 = scmp.ne.s32.totalorder %s4465_s9, %s3162_s26  ;;  %p3166_p2 = scmp.lt.u32.totalorder %s3162_s26, %s4465_s9 }
 0x406   :  { %p3168_p3 = pnand %p3166_p2, %p3163_p1 }
 0x408   :  { %3171 = shalt.err (!%p3168_p3)
}
 0x409   :  { %2758 = dma.vmem_to_hbm [thread:$0]  %s2753_s8, 512, %s4465_s9, [#allocation4], %s3180_s21, %s3180_s21, %s3181_s22  }
 0x40a   :  { %3176 = dma.done.wait [#allocation4], 512  }
 0x40b   :  { %3177 = vsyncadd [#allocation4], 4294966784 }
 0x40c   :  { %2762 = vsyncpa [#allocation3], 1 }
 0x40d   :  { %2763 = vsyncpa [#allocation6], 1 }
 0x40e   :  { %2764 = vsyncpa [#allocation4], 1 }

</bundles_post_ra>
